<compile_context>
chip_gen: v6e
topology: v6e:2x2x1
jax: 0.10.0
libtpu: 0.0.40
codegen_flags: <defaults>
</compile_context>

<pallas_src>
import functools

import jax
import jax.numpy as jnp
from jax import lax
from jax.experimental import pallas as pl
from jax.experimental.pallas import tpu as pltpu


# ---------------------------------------------------------------------------
# Kernel: fused im2col (VMEM patch) + single MXU matmul + bias, one row band.
#   x_ref     : (1, Hp, Wp, C)   whole padded NHWC image, bf16
#   w_ref     : (KH*KW*C, OCp)   fused pre-masked weights, bf16
#   b_ref     : (1, OCp)         pre-masked bias, f32
#   o_ref     : (1, TM, OCp)     output row band (TM = TR*OW), lane-dense
#   patch_ref : (TM, KH*KW*C)    VMEM scratch im2col patch, bf16
# ---------------------------------------------------------------------------
def _cconv2d_kernel(x_ref, w_ref, b_ref, o_ref, patch_ref, *, kh, kw, tr, ow):
    c = x_ref.shape[-1]
    m = tr * ow
    r0 = pl.multiple_of(pl.program_id(1) * tr, tr)  # first output row of band

    # Build the im2col patch: one window copy per kernel tap.  The
    # (tr, ow, c) -> (m, c) collapse keeps the lane dim (c) unchanged; for
    # ow % 8 == 0 it is sublane-exact, so no cross-lane relayout.
    for i in range(kh):
        for j in range(kw):
            xs = x_ref[0, pl.ds(r0 + i, tr), pl.ds(j, ow), :]     # (tr, ow, c)
            patch_ref[:, pl.ds((i * kw + j) * c, c)] = xs.reshape(m, c)

    # Single MXU matmul, K = KH*KW*C (all taps fused into the contraction).
    acc = jnp.dot(patch_ref[...], w_ref[...],
                  preferred_element_type=jnp.float32)             # (m, ocp) f32
    o_ref[0] = (acc + b_ref[...]).astype(o_ref.dtype)


def _pick_band_rows(oh, ow, target_m=512):
    """Output rows per grid step: tr | oh, tm = tr*ow a multiple of 8
    (clean output blocks), tm <= target_m (bounds patch/output VMEM),
    and >= 2 bands when possible (second parallel axis for megacore)."""
    valid = [t for t in range(1, oh) if oh % t == 0 and (t * ow) % 8 == 0]
    small = [t for t in valid if t * ow <= target_m]
    if small:
        return max(small)
    if valid:
        return min(valid)
    return oh  # single whole-image band (block == full dim, always legal)


def _space_to_depth(xp, PW, stride, oh, ow):
    """Rewrite a stride-s conv over xp (N,Hp,Wp,C) with weights PW
    (OC,C,KH,KW) as an equivalent stride-1 conv over (N,H',W',s*s*C) with
    kernel (ceil(KH/s), ceil(KW/s)).  Pure wrapper-side rearrangement."""
    n, _, _, c = xp.shape
    oc, _, kh, kw = PW.shape
    s = stride
    kh2, kw2 = -(-kh // s), -(-kw // s)
    hp_need, wp_need = (oh + kh2 - 1) * s, (ow + kw2 - 1) * s
    xp = xp[:, :hp_need, :wp_need, :]
    xp = jnp.pad(xp, ((0, 0), (0, hp_need - xp.shape[1]),
                      (0, wp_need - xp.shape[2]), (0, 0)))
    xp = xp.reshape(n, hp_need // s, s, wp_need // s, s, c)
    xp = xp.transpose(0, 1, 3, 2, 4, 5).reshape(
        n, hp_need // s, wp_need // s, s * s * c)
    # W'[o, (ri,rj,c), qi, qj] = PW[o, c, qi*s+ri, qj*s+rj]  (0 when OOB).
    PWp = jnp.zeros((oc, c, kh2 * s, kw2 * s), PW.dtype)
    PWp = PWp.at[:, :, :kh, :kw].set(PW)
    PWp = PWp.reshape(oc, c, kh2, s, kw2, s).transpose(0, 3, 5, 1, 2, 4)
    PWp = PWp.reshape(oc, s * s * c, kh2, kw2)
    return xp, PWp, kh2, kw2, s * s * c


@functools.partial(jax.jit, static_argnames=("stride", "padding"))
def cconv2d_forward(x, W, b, C_W=None, C_b=None, *, stride=1, padding=0):
    """cConv2d forward. x: (N, C, H, W) NCHW (PyTorch layout); returns NCHW."""
    n, c_in, h, w = x.shape
    oc, _, kh, kw = W.shape
    oh = (h + 2 * padding - kh) // stride + 1
    ow = (w + 2 * padding - kw) // stride + 1

    # Grid-invariant mask products, hoisted out of the kernel.
    PW = W if C_W is None else C_W * W
    if b is None:
        Pb = jnp.zeros((oc,), jnp.float32)
    else:
        Pb = (b if C_b is None else C_b * b).astype(jnp.float32)

    # NHWC + spatial zero pad (the NCHW<->NHWC transposes are layout plumbing
    # imposed by the PyTorch interface; in an NHWC network they disappear).
    xp = jnp.pad(x.transpose(0, 2, 3, 1),
                 ((0, 0), (padding, padding), (padding, padding), (0, 0)))

    if stride > 1:
        xp, PW_eff, kh_e, kw_e, c_e = _space_to_depth(xp, PW, stride, oh, ow)
    else:
        PW_eff, kh_e, kw_e, c_e = PW, kh, kw, c_in

    hp, wp = xp.shape[1], xp.shape[2]
    kc = kh_e * kw_e * c_e

    # Lane-dense output channels (unmasked vst, full MXU result columns).
    # TODO(synk): for OC << 128 this inflates the padded writeback; real
    # ResNet layers have OC >= 64 and the post-kernel slice fuses in XLA.
    ocp = ((oc + 127) // 128) * 128

    # Fused weight slab: wf[(i*KW + j)*C + c, o] = PW_eff[o, c, i, j].
    wf = PW_eff.transpose(2, 3, 1, 0).reshape(kc, oc)
    wf = jnp.pad(wf, ((0, 0), (0, ocp - oc))).astype(jnp.bfloat16)
    b_row = jnp.pad(Pb.reshape(1, oc), ((0, 0), (0, ocp - oc)))

    # bf16 activations for the MXU (accumulation stays f32 in the kernel).
    xp = xp.astype(jnp.bfloat16)

    tr = _pick_band_rows(oh, ow)     # output rows per grid step
    nbands = oh // tr
    tm = tr * ow

    kernel = functools.partial(_cconv2d_kernel, kh=kh_e, kw=kw_e, tr=tr, ow=ow)

    out_flat = pl.pallas_call(
        kernel,
        out_shape=jax.ShapeDtypeStruct((n, oh * ow, ocp), x.dtype),
        grid_spec=pltpu.PrefetchScalarGridSpec(
            num_scalar_prefetch=0,
            grid=(n, nbands),
            in_specs=[
                # Whole padded image per batch element; index_map is constant
                # across the band axis, so it is DMA'd once per image.
                # TODO(synk): for very large spatial extents switch this to
                # pl.ANY + manual halo'd band DMA to bound input VMEM too.
                pl.BlockSpec((1, hp, wp, c_e), lambda i, bb: (i, 0, 0, 0)),
                # Grid-invariant weights / bias (constant index_map => no
                # re-DMA across steps; footprint is tiny at these shapes).
                pl.BlockSpec((kc, ocp), lambda i, bb: (0, 0)),
                pl.BlockSpec((1, ocp), lambda i, bb: (0, 0)),
            ],
            out_specs=pl.BlockSpec((1, tm, ocp), lambda i, bb: (i, bb, 0)),
            scratch_shapes=[pltpu.VMEM((tm, kc), jnp.bfloat16)],
        ),
        compiler_params=pltpu.CompilerParams(
            dimension_semantics=("parallel", "parallel"),
            vmem_limit_bytes=64 * 1024 * 1024),
    )(xp, wf, b_row)

    out = out_flat[:, :, :oc].reshape(n, oh, ow, oc).transpose(0, 3, 1, 2)
    return out


if __name__ == "__main__":
    # Module config: cConv2d(in_channels=4, out_channels=8, kernel_size=3,
    # padding=1) after generate_random_mask(0.1).
    # TODO(synk): dilation / groups / padding_mode are stored by the module
    # but its forward() never forwards them to F.conv2d; ignored here too.
    in_channels, out_channels, ksize = 4, 8, 3
    noise_scale = 0.1

    key = jax.random.PRNGKey(0)
    kx, kw_, kb, kcw, kcb = jax.random.split(key, 5)

    # Deterministic "nn.Conv2d"-style init (uniform in +-1/sqrt(fan_in)).
    fan_in = in_channels * ksize * ksize
    bound = 1.0 / jnp.sqrt(fan_in)
    W = jax.random.uniform(kw_, (out_channels, in_channels, ksize, ksize),
                           jnp.float32, -bound, bound)
    b = jax.random.uniform(kb, (out_channels,), jnp.float32, -bound, bound)

    # generate_random_mask(noise_scale): C = Normal(0, noise_scale) + 1
    C_W = jax.random.normal(kcw, W.shape, jnp.float32) * noise_scale + 1.0
    C_b = jax.random.normal(kcb, b.shape, jnp.float32) * noise_scale + 1.0

    # Input (N, C, H, W) — NCHW like PyTorch.
    x = jax.random.normal(kx, (2, 4, 16, 16), jnp.float32)

    # Reference uses the same bf16 quantization of activations/weights that
    # the MXU sees; accumulation is f32 on both sides (HIGHEST precision).
    xq = x.astype(jnp.bfloat16).astype(jnp.float32)
    PWq = (C_W * W).astype(jnp.bfloat16).astype(jnp.float32)
    Pb = (C_b * b).reshape(1, -1, 1, 1)

    for stride, padding in ((1, 1), (2, 1)):
        out = cconv2d_forward(x, W, b, C_W, C_b, stride=stride, padding=padding)
        out = jax.block_until_ready(out)
        ref = lax.conv_general_dilated(
            xq, PWq, window_strides=(stride, stride),
            padding=[(padding, padding), (padding, padding)],
            dimension_numbers=("NCHW", "OIHW", "NCHW"),
            precision=lax.Precision.HIGHEST) + Pb
        assert out.shape == ref.shape, (out.shape, ref.shape)
        assert jnp.allclose(out, ref, atol=2e-3, rtol=2e-3), (
            stride, padding, float(jnp.max(jnp.abs(out - ref))))

    print("KERNEL_OK")
</pallas_src>

<mosaic_0001>
module attributes {stable_mosaic.version = 11 : i64} {
  func.func @_cconv2d_kernel(%arg0: i32, %arg1: i32, %arg2: memref<1x18x18x4xbf16, #tpu.memory_space<vmem>>, %arg3: memref<36x128xbf16, #tpu.memory_space<vmem>>, %arg4: memref<1x128xf32, #tpu.memory_space<vmem>>, %arg5: memref<1x128x128xf32, #tpu.memory_space<vmem>>, %arg6: memref<128x36xbf16, #tpu.memory_space<vmem>>) attributes {dimension_semantics = [#tpu.dimension_semantics<parallel>, #tpu.dimension_semantics<parallel>], iteration_bounds = array<i64: 2, 2>, scalar_prefetch = 0 : i64, scratch_operands = 1 : i64, tpu.core_type = #tpu.core_type<tc>, window_params = [{transform_indices = @transform_0, window_bounds = array<i64: 1, 18, 18, 4>}, {pipeline_mode = #tpu.pipeline_mode<synchronous>, transform_indices = @transform_1, window_bounds = array<i64: 36, 128>}, {pipeline_mode = #tpu.pipeline_mode<synchronous>, transform_indices = @transform_2, window_bounds = array<i64: 1, 128>}, {transform_indices = @transform_3, window_bounds = array<i64: 1, 128, 128>}]} {
    %c8_i32 = arith.constant 8 : i32
    %0 = arith.muli %arg1, %c8_i32 : i32
    %1 = tpu.assume_multiple %0, 8 : i32
    %c0_i32 = arith.constant 0 : i32
    %2 = arith.addi %1, %c0_i32 : i32
    %c0 = arith.constant 0 : index
    %3 = arith.index_cast %2 : i32 to index
    %c0_0 = arith.constant 0 : index
    %c0_1 = arith.constant 0 : index
    %4 = vector.load %arg2[%c0, %3, %c0_0, %c0_1] : memref<1x18x18x4xbf16, #tpu.memory_space<vmem>>, vector<1x8x16x4xbf16>
    %5 = vector.shape_cast %4 : vector<1x8x16x4xbf16> to vector<8x16x4xbf16>
    %6 = vector.shape_cast %5 : vector<8x16x4xbf16> to vector<128x4xbf16>
    %c0_2 = arith.constant 0 : index
    %c0_3 = arith.constant 0 : index
    %7 = vector.load %arg6[%c0_2, %c0_3] : memref<128x36xbf16, #tpu.memory_space<vmem>>, vector<128x4xbf16>
    tpu.vector_store %arg6[%c0_2, %c0_3], %6 {strides = array<i32>} : memref<128x36xbf16, #tpu.memory_space<vmem>>, vector<128x4xbf16>,
    %c0_i32_4 = arith.constant 0 : i32
    %8 = arith.addi %1, %c0_i32_4 : i32
    %c0_5 = arith.constant 0 : index
    %9 = arith.index_cast %8 : i32 to index
    %c1 = arith.constant 1 : index
    %c0_6 = arith.constant 0 : index
    %10 = vector.load %arg2[%c0_5, %9, %c1, %c0_6] : memref<1x18x18x4xbf16, #tpu.memory_space<vmem>>, vector<1x8x16x4xbf16>
    %11 = vector.shape_cast %10 : vector<1x8x16x4xbf16> to vector<8x16x4xbf16>
    %12 = vector.shape_cast %11 : vector<8x16x4xbf16> to vector<128x4xbf16>
    %c0_7 = arith.constant 0 : index
    %c4 = arith.constant 4 : index
    %13 = vector.load %arg6[%c0_7, %c4] : memref<128x36xbf16, #tpu.memory_space<vmem>>, vector<128x4xbf16>
    tpu.vector_store %arg6[%c0_7, %c4], %12 {strides = array<i32>} : memref<128x36xbf16, #tpu.memory_space<vmem>>, vector<128x4xbf16>,
    %c0_i32_8 = arith.constant 0 : i32
    %14 = arith.addi %1, %c0_i32_8 : i32
    %c0_9 = arith.constant 0 : index
    %15 = arith.index_cast %14 : i32 to index
    %c2 = arith.constant 2 : index
    %c0_10 = arith.constant 0 : index
    %16 = vector.load %arg2[%c0_9, %15, %c2, %c0_10] : memref<1x18x18x4xbf16, #tpu.memory_space<vmem>>, vector<1x8x16x4xbf16>
    %17 = vector.shape_cast %16 : vector<1x8x16x4xbf16> to vector<8x16x4xbf16>
    %18 = vector.shape_cast %17 : vector<8x16x4xbf16> to vector<128x4xbf16>
    %c0_11 = arith.constant 0 : index
    %c8 = arith.constant 8 : index
    %19 = vector.load %arg6[%c0_11, %c8] : memref<128x36xbf16, #tpu.memory_space<vmem>>, vector<128x4xbf16>
    tpu.vector_store %arg6[%c0_11, %c8], %18 {strides = array<i32>} : memref<128x36xbf16, #tpu.memory_space<vmem>>, vector<128x4xbf16>,
    %c1_i32 = arith.constant 1 : i32
    %20 = arith.addi %1, %c1_i32 : i32
    %c0_12 = arith.constant 0 : index
    %21 = arith.index_cast %20 : i32 to index
    %c0_13 = arith.constant 0 : index
    %c0_14 = arith.constant 0 : index
    %22 = vector.load %arg2[%c0_12, %21, %c0_13, %c0_14] : memref<1x18x18x4xbf16, #tpu.memory_space<vmem>>, vector<1x8x16x4xbf16>
    %23 = vector.shape_cast %22 : vector<1x8x16x4xbf16> to vector<8x16x4xbf16>
    %24 = vector.shape_cast %23 : vector<8x16x4xbf16> to vector<128x4xbf16>
    %c0_15 = arith.constant 0 : index
    %c12 = arith.constant 12 : index
    %25 = vector.load %arg6[%c0_15, %c12] : memref<128x36xbf16, #tpu.memory_space<vmem>>, vector<128x4xbf16>
    tpu.vector_store %arg6[%c0_15, %c12], %24 {strides = array<i32>} : memref<128x36xbf16, #tpu.memory_space<vmem>>, vector<128x4xbf16>,
    %c1_i32_16 = arith.constant 1 : i32
    %26 = arith.addi %1, %c1_i32_16 : i32
    %c0_17 = arith.constant 0 : index
    %27 = arith.index_cast %26 : i32 to index
    %c1_18 = arith.constant 1 : index
    %c0_19 = arith.constant 0 : index
    %28 = vector.load %arg2[%c0_17, %27, %c1_18, %c0_19] : memref<1x18x18x4xbf16, #tpu.memory_space<vmem>>, vector<1x8x16x4xbf16>
    %29 = vector.shape_cast %28 : vector<1x8x16x4xbf16> to vector<8x16x4xbf16>
    %30 = vector.shape_cast %29 : vector<8x16x4xbf16> to vector<128x4xbf16>
    %c0_20 = arith.constant 0 : index
    %c16 = arith.constant 16 : index
    %31 = vector.load %arg6[%c0_20, %c16] : memref<128x36xbf16, #tpu.memory_space<vmem>>, vector<128x4xbf16>
    tpu.vector_store %arg6[%c0_20, %c16], %30 {strides = array<i32>} : memref<128x36xbf16, #tpu.memory_space<vmem>>, vector<128x4xbf16>,
    %c1_i32_21 = arith.constant 1 : i32
    %32 = arith.addi %1, %c1_i32_21 : i32
    %c0_22 = arith.constant 0 : index
    %33 = arith.index_cast %32 : i32 to index
    %c2_23 = arith.constant 2 : index
    %c0_24 = arith.constant 0 : index
    %34 = vector.load %arg2[%c0_22, %33, %c2_23, %c0_24] : memref<1x18x18x4xbf16, #tpu.memory_space<vmem>>, vector<1x8x16x4xbf16>
    %35 = vector.shape_cast %34 : vector<1x8x16x4xbf16> to vector<8x16x4xbf16>
    %36 = vector.shape_cast %35 : vector<8x16x4xbf16> to vector<128x4xbf16>
    %c0_25 = arith.constant 0 : index
    %c20 = arith.constant 20 : index
    %37 = vector.load %arg6[%c0_25, %c20] : memref<128x36xbf16, #tpu.memory_space<vmem>>, vector<128x4xbf16>
    tpu.vector_store %arg6[%c0_25, %c20], %36 {strides = array<i32>} : memref<128x36xbf16, #tpu.memory_space<vmem>>, vector<128x4xbf16>,
    %c2_i32 = arith.constant 2 : i32
    %38 = arith.addi %1, %c2_i32 : i32
    %c0_26 = arith.constant 0 : index
    %39 = arith.index_cast %38 : i32 to index
    %c0_27 = arith.constant 0 : index
    %c0_28 = arith.constant 0 : index
    %40 = vector.load %arg2[%c0_26, %39, %c0_27, %c0_28] : memref<1x18x18x4xbf16, #tpu.memory_space<vmem>>, vector<1x8x16x4xbf16>
    %41 = vector.shape_cast %40 : vector<1x8x16x4xbf16> to vector<8x16x4xbf16>
    %42 = vector.shape_cast %41 : vector<8x16x4xbf16> to vector<128x4xbf16>
    %c0_29 = arith.constant 0 : index
    %c24 = arith.constant 24 : index
    %43 = vector.load %arg6[%c0_29, %c24] : memref<128x36xbf16, #tpu.memory_space<vmem>>, vector<128x4xbf16>
    tpu.vector_store %arg6[%c0_29, %c24], %42 {strides = array<i32>} : memref<128x36xbf16, #tpu.memory_space<vmem>>, vector<128x4xbf16>,
    %c2_i32_30 = arith.constant 2 : i32
    %44 = arith.addi %1, %c2_i32_30 : i32
    %c0_31 = arith.constant 0 : index
    %45 = arith.index_cast %44 : i32 to index
    %c1_32 = arith.constant 1 : index
    %c0_33 = arith.constant 0 : index
    %46 = vector.load %arg2[%c0_31, %45, %c1_32, %c0_33] : memref<1x18x18x4xbf16, #tpu.memory_space<vmem>>, vector<1x8x16x4xbf16>
    %47 = vector.shape_cast %46 : vector<1x8x16x4xbf16> to vector<8x16x4xbf16>
    %48 = vector.shape_cast %47 : vector<8x16x4xbf16> to vector<128x4xbf16>
    %c0_34 = arith.constant 0 : index
    %c28 = arith.constant 28 : index
    %49 = vector.load %arg6[%c0_34, %c28] : memref<128x36xbf16, #tpu.memory_space<vmem>>, vector<128x4xbf16>
    tpu.vector_store %arg6[%c0_34, %c28], %48 {strides = array<i32>} : memref<128x36xbf16, #tpu.memory_space<vmem>>, vector<128x4xbf16>,
    %c2_i32_35 = arith.constant 2 : i32
    %50 = arith.addi %1, %c2_i32_35 : i32
    %c0_36 = arith.constant 0 : index
    %51 = arith.index_cast %50 : i32 to index
    %c2_37 = arith.constant 2 : index
    %c0_38 = arith.constant 0 : index
    %52 = vector.load %arg2[%c0_36, %51, %c2_37, %c0_38] : memref<1x18x18x4xbf16, #tpu.memory_space<vmem>>, vector<1x8x16x4xbf16>
    %53 = vector.shape_cast %52 : vector<1x8x16x4xbf16> to vector<8x16x4xbf16>
    %54 = vector.shape_cast %53 : vector<8x16x4xbf16> to vector<128x4xbf16>
    %c0_39 = arith.constant 0 : index
    %c32 = arith.constant 32 : index
    %55 = vector.load %arg6[%c0_39, %c32] : memref<128x36xbf16, #tpu.memory_space<vmem>>, vector<128x4xbf16>
    tpu.vector_store %arg6[%c0_39, %c32], %54 {strides = array<i32>} : memref<128x36xbf16, #tpu.memory_space<vmem>>, vector<128x4xbf16>,
    %c0_40 = arith.constant 0 : index
    %c0_41 = arith.constant 0 : index
    %56 = vector.load %arg6[%c0_40, %c0_41] : memref<128x36xbf16, #tpu.memory_space<vmem>>, vector<128x36xbf16>
    %c0_42 = arith.constant 0 : index
    %c0_43 = arith.constant 0 : index
    %57 = vector.load %arg3[%c0_42, %c0_43] : memref<36x128xbf16, #tpu.memory_space<vmem>>, vector<36x128xbf16>
    %cst = arith.constant dense<0.000000e+00> : vector<128x128xf32>
    %58 = tpu.matmul %56, %57, %cst {dimension_numbers = #tpu.dot_dimension_numbers<[1], [0], [0], [1], [0, 0, 1, 1], [], []>} : vector<128x36xbf16>, vector<36x128xbf16>, vector<128x128xf32> -> vector<128x128xf32>
    %c0_44 = arith.constant 0 : index
    %c0_45 = arith.constant 0 : index
    %59 = vector.load %arg4[%c0_44, %c0_45] : memref<1x128xf32, #tpu.memory_space<vmem>>, vector<1x128xf32>
    %60 = vector.broadcast %59 : vector<1x128xf32> to vector<128x128xf32>
    %61 = arith.addf %58, %60 : vector<128x128xf32>
    %c0_46 = arith.constant 0 : index
    %c0_47 = arith.constant 0 : index
    %c0_48 = arith.constant 0 : index
    %62 = vector.load %arg5[%c0_46, %c0_47, %c0_48] : memref<1x128x128xf32, #tpu.memory_space<vmem>>, vector<1x128x128xf32>
    %63 = vector.shape_cast %62 : vector<1x128x128xf32> to vector<128x128xf32>
    %64 = vector.shape_cast %61 : vector<128x128xf32> to vector<1x128x128xf32>
    tpu.vector_store %arg5[%c0_46, %c0_47, %c0_48], %64 {strides = array<i32>} : memref<1x128x128xf32, #tpu.memory_space<vmem>>, vector<1x128x128xf32>,
    return
  }
  func.func @transform_0(%arg0: i32, %arg1: i32) -> (i32, i32, i32, i32) {
    %c0_i32 = arith.constant 0 : i32
    %c0_i32_0 = arith.constant 0 : i32
    %c0_i32_1 = arith.constant 0 : i32
    %c0_i32_2 = arith.constant 0 : i32
    return %arg0, %c0_i32, %c0_i32_0, %c0_i32_1 : i32, i32, i32, i32
  }
  func.func @transform_1(%arg0: i32, %arg1: i32) -> (i32, i32) {
    %c0_i32 = arith.constant 0 : i32
    %c0_i32_0 = arith.constant 0 : i32
    %c0_i32_1 = arith.constant 0 : i32
    return %c0_i32, %c0_i32_0 : i32, i32
  }
  func.func @transform_2(%arg0: i32, %arg1: i32) -> (i32, i32) {
    %c0_i32 = arith.constant 0 : i32
    %c0_i32_0 = arith.constant 0 : i32
    %c0_i32_1 = arith.constant 0 : i32
    return %c0_i32, %c0_i32_0 : i32, i32
  }
  func.func @transform_3(%arg0: i32, %arg1: i32) -> (i32, i32, i32) {
    %c0_i32 = arith.constant 0 : i32
    %c0_i32_0 = arith.constant 0 : i32
    return %arg0, %arg1, %c0_i32 : i32, i32, i32
  }
}

</mosaic_0001>

<bundles_post_ra>
// kernel: cconv2d_forward.1
= control target key start
LH: loop header
LB: loop body
LE: loop exit
PB: predicated region body
PF: predicated region fallthrough
CT: control target
= control target key end

     0   :  { %s2469_s12 = smov 0   ;;  %s2471_s13 = smov 0   ;;  %s3326_s0 = inlined_call_operand.vmem [shape: bf16[2,18,18,4], index: 0, kind: input, shape index: {}]   ;;  %s3327_s1 = inlined_call_operand.vmem [shape: bf16[36,128], index: 1, kind: input, shape index: {}]   ;;  %s3328_s2 = inlined_call_operand.vmem [shape: f32[1,128], index: 2, kind: input, shape index: {}]   ;;  %s3329_s3 = inlined_call_operand.vmem [shape: f32[2,256,128], index: 3, kind: output, shape index: {}]  }
   0x1   :  { %s2473_s14 = smov 0   ;;  %s2475_s15 = smov 0  }
   0x2   :  { %s2477_s16 = smov 0  }
   0x3 LB: > { %s22_s17 = sadd.s32 1, %s2431_s14  ;;  %s25_s18 = sadd.s32 1, %s2435_s15  ;;  %s2439_s16 = sphi %s2477_s16, %s13_s16   ;;  %s2435_s15 = sphi %s2475_s15, %s3337_s15   ;;  %s2431_s14 = sphi %s2473_s14, %s3336_s14   ;;  %s2427_s13 = sphi %s2471_s13, %s3335_s13   ;;  %s2423_s12 = sphi %s2469_s12, %s3334_s12  }
   0x4   : > { %p23_p0 = scmp.ge.s32.totalorder %s22_s17, 2  ;;  %p2113_p1 = scmp.ge.s32.totalorder %s2439_s16, 1 }
   0x5   : > { %p151_p2 = scmp.lt.s32.totalorder %s2439_s16, 5 }
   0x6   : > { %s3339_s17 = smov (%p23_p0, %s22_s17), 0  ;;  %s3341_s18 = smov (!%p23_p0, %s25_s18), %s2435_s15 }
   0x7   : > { %p152_p3 = pnand %p2113_p1, %p151_p2  ;;  %p27_p4 = scmp.ge.s32.totalorder %s3341_s18, 2 }
   0x8   : > { %p179_p5 = scmp.lt.s32.totalorder (!%p152_p3), %s2427_s13, 1  ;;  %s2299_s19 = smul.u32 (!%p152_p3), 96, %s2423_s12 }
   0x9   : > { %s3343_s18 = smov (%p27_p4, %s3341_s18), 0  ;;  %155 = sbr.rel (%p152_p3) target bundleno = 605 (0x25d), region = 32 }
   0xa   : > { %s2441_s25 = smov (!%p152_p3), 8   ;;  %s2442_s26 = smov (!%p152_p3), 4  }
   0xb   : > { %s2443_s27 = smov (!%p152_p3), 12   ;;  %s2444_s28 = smov (!%p152_p3), 16  }
   0xc   : > { %s2445_s29 = smov (!%p152_p3), 20   ;;  %s2446_s30 = smov (!%p152_p3), 24  }
   0xd   : > { %s2447_s4 = smov (!%p152_p3), 28   ;;  %s2448_s5 = smov (!%p152_p3), 32  }
   0xe   : > { %s3345_s13 = smov (!%p179_p5, %s2427_s13), 1  ;;  %vm564_vm0 = vcmask 1042432   ;;  %vm565_vm1 = vcmask 1046532   ;;  %vm256_vm3 = vsmask.f32 3328  ;;  %vm215_vm6 = vcmask 27648  }
   0xf   : > { %s2341_s20 = smul.u32 216, %s3345_s13  ;;  %vm2510_vm2 = vmor %vm564_vm0, %vm565_vm1  ;;  %vm257_vm4 = vsmask.f32 7440  ;;  %vm499_vm7 = vcmask 60448   ;;  %vm671_vm8 = vcmask 93248   ;;  %vm1898_vm9 = vcmask 1041408  }
  0x10   : > { %vm2532_vm5 = vmor %vm256_vm3, %vm257_vm4  ;;  %vm772_vm10 = vcmask 126048   ;;  %vm1053_vm11 = vcmask 158848   ;;  %vm1222_vm12 = vcmask 191648   ;;  %vm1323_vm13 = vcmask 224448  }
  0x11   : > { %s183_s23 = scalar_lea.vmem %s3326_s0, %s2341_s20  ;;  %vm1604_vm14 = vcmask 257248   ;;  %vm1773_vm15 = vcmask 290048   ;;  %vm1873_vm0 = vcmask 293888   ;;  %s2116_s20 = sshll.u32 %s3345_s13, 5 }
  0x12   : > { %s2508_s24 = scalar_lea.vmem %s183_s23, %s2299_s19  ;;  %s2115_s19 = sshll.u32 %s2423_s12, 4 }
  0x13   : > { %v517_v1 = vld [vmem:[%s2508_s24 + $0x4] sm:$0xf]  ;;  %v518_v2 = vld [vmem:[%s2508_s24 + $0x8] sm:$0x1]  ;;  %v516_v3 = vld [vmem:[%s2508_s24] sm:$0xe] }
  0x14   : > { %v569_v4 = vrot.slane %v517_v1, 5  ;;  %v572_v5 = vrot.slane %v518_v2, 5  ;;  %v2121_v6 = vrot.slane %v516_v3, 9  ;;  %v244_v7 = vld [vmem:[%s2508_s24 + $0x30] sm:$0xf]  ;;  %p187_p6 = scmp.lt.s32.totalorder %s2115_s19, 31 }
  0x15   : > { %v245_v8 = vld [vmem:[%s2508_s24 + $0x34] sm:$0xf]  ;;  %v356_v9 = vshrl.u32 %v244_v7, 16  ;;  %v359_v10 = vshll.u32 %v244_v7, 16  ;;  %v232_v11 = vld [vmem:[%s2508_s24] sm:$0xf] }
  0x16   : > { %v571_v12 = vrot.slane %v569_v4, 4  ;;  %v570_v13 = vsel %vm2510_vm2, %v2121_v6, %v569_v4  ;;  %v365_v14 = vshll.u32 %v245_v8, 16  ;;  %v369_v15 = vshrl.u32 %v245_v8, 16  ;;  %v233_v16 = vld [vmem:[%s2508_s24 + $0x4] sm:$0xf]  ;;  %s3347_s19 = smov (!%p187_p6, %s2115_s19), 31 }
  0x17   : > { %623 = vrot.lane.b32.xlu0 %v570_v13, %s2441_s25  ;;  %v358_v17 = vrot.slane %v356_v9, 4  ;;  %v361_v18 = vrot.slane %v359_v10, 5  ;;  %v260_v19 = vshrl.u32 %v232_v11, 16  ;;  %v263_v20 = vshll.u32 %v232_v11, 16  ;;  %v246_v21 = vld [vmem:[%s2508_s24 + $0x38] sm:$0x1]  ;;  %s190_s21 = sadd.s32 %s2116_s20, %s3347_s19 }
  0x18   : > { %v573_v22 = vsel %vm2510_vm2, %v571_v12, %v572_v5  ;;  %v367_v23 = vrot.slane %v365_v14, 5  ;;  %v269_v24 = vshll.u32 %v233_v16, 16  ;;  %v273_v25 = vshrl.u32 %v233_v16, 16  ;;  %v234_v26 = vld [vmem:[%s2508_s24 + $0x8] sm:$0x1]  ;;  %s2117_s22 = sshll.u32 %s190_s21, 3 }
  0x19   : > { %625 = vrot.lane.b32.xlu1 %v573_v22, %s2441_s25  ;;  %v362_v27 = vor.u32 %v361_v18, %v358_v17  ;;  %v262_v28 = vrot.slane %v260_v19, 4  ;;  %v265_v29 = vrot.slane %v263_v20, 5  ;;  %v371_v30 = vrot.slane %v369_v15, 4  ;;  %v236_v31 = vld [vmem:[%s2508_s24 + $0x10] sm:$0xf] }
  0x1a   : > { %v271_v33 = vrot.slane %v269_v24, 5  ;;  %v375_v34 = vshll.u32 %v246_v21, 16  ;;  %v275_v35 = vrot.slane %v273_v25, 4  ;;  %v279_v36 = vshll.u32 %v234_v26, 16  ;;  %v237_v40 = vld [vmem:[%s2508_s24 + $0x14] sm:$0x1] }
  0x1b   : > { %v363_v37 = vrot.slane %v362_v27, 4  ;;  %v266_v38 = vor.u32 %v265_v29, %v262_v28  ;;  %v372_v39 = vor.u32 %v371_v30, %v367_v23  ;;  %v293_v41 = vshll.u32 %v236_v31, 16  ;;  %v235_v42 = vld [vmem:[%s2508_s24 + $0xc] sm:$0xf]  ;;  %v248_v47 = vld [vmem:[%s2508_s24 + $0x40] sm:$0xf] }
  0x1c   : > { %v377_v43 = vrot.slane %v375_v34, 5  ;;  %v276_v44 = vor.u32 %v275_v35, %v271_v33  ;;  %v281_v45 = vrot.slane %v279_v36, 5  ;;  %v297_v46 = vshrl.u32 %v236_v31, 16  ;;  %v249_v56 = vld [vmem:[%s2508_s24 + $0x44] sm:$0x1] }
  0x1d   : > { %v368_v48 = vsel %vm2532_vm5, %v363_v37, %v367_v23  ;;  %v267_v49 = vrot.slane %v266_v38, 4  ;;  %v373_v50 = vrot.slane %v372_v39, 4  ;;  %v295_v51 = vrot.slane %v293_v41, 5  ;;  %v247_v61 = vld [vmem:[%s2508_s24 + $0x3c] sm:$0xf] }
  0x1e   : > { %467 = vrot.lane.b32.xlu1 %v368_v48, %s2442_s26  ;;  %v277_v52 = vrot.slane %v276_v44, 4  ;;  %v299_v53 = vrot.slane %v297_v46, 4  ;;  %v303_v54 = vshll.u32 %v237_v40, 16  ;;  %v284_v55 = vshrl.u32 %v235_v42, 16  ;;  %v529_v3 = vld [vmem:[%s2508_s24 + $0x34] sm:$0xf] }
  0x1f   : > { %v272_v57 = vsel %vm2532_vm5, %v267_v49, %v271_v33  ;;  %v378_v58 = vsel %vm2532_vm5, %v373_v50, %v377_v43  ;;  %v287_v59 = vshll.u32 %v235_v42, 16  ;;  %v389_v60 = vshll.u32 %v248_v47, 16  ;;  %v530_v13 = vld [vmem:[%s2508_s24 + $0x38] sm:$0x1]  ;;  %v520_v18 = vld [vmem:[%s2508_s24 + $0x10] sm:$0xf] }
  0x20   : > { %451 = vrot.lane.b32.xlu0 %v272_v57, %s2442_s26  ;;  %v282_v62 = vsel %vm2532_vm5, %v277_v52, %v281_v45  ;;  %v300_v63 = vor.u32 %v299_v53, %v295_v51  ;;  %v305_v1 = vrot.slane %v303_v54, 5  ;;  %v286_v2 = vrot.slane %v284_v55, 4  ;;  %v528_v24 = vld [vmem:[%s2508_s24 + $0x30] sm:$0xe]  ;;  %v521_v30 = vld [vmem:[%s2508_s24 + $0x14] sm:$0x1] }
  0x21   : > { %v289_v4 = vrot.slane %v287_v59, 5  ;;  %v391_v5 = vrot.slane %v389_v60, 5  ;;  %v393_v6 = vshrl.u32 %v248_v47, 16  ;;  %v399_v7 = vshll.u32 %v249_v56, 16  ;;  %v532_v31 = vld [vmem:[%s2508_s24 + $0x40] sm:$0xf] }
  0x22   : > { %469 = vrot.lane.b32.xlu1 %v378_v58, %s2442_s26  ;;  %v301_v8 = vrot.slane %v300_v63, 4  ;;  %v380_v9 = vshrl.u32 %v247_v61, 16  ;;  %v383_v10 = vshll.u32 %v247_v61, 16  ;;  %v597_v14 = vrot.slane %v529_v3, 5  ;;  %v519_v36 = vld [vmem:[%s2508_s24 + $0xc] sm:$0xe] }
  0x23   : > { %v290_v11 = vor.u32 %v289_v4, %v286_v2  ;;  %v395_v12 = vrot.slane %v393_v6, 4  ;;  %v401_v21 = vrot.slane %v399_v7, 5  ;;  %v600_v23 = vrot.slane %v530_v13, 5  ;;  %v533_v41 = vld [vmem:[%s2508_s24 + $0x44] sm:$0x1] }
  0x24   : > { %453 = vrot.lane.b32.xlu0 %v282_v62, %s2442_s26  ;;  %v306_v15 = vsel %vm2532_vm5, %v301_v8, %v305_v1  ;;  %v382_v16 = vrot.slane %v380_v9, 4  ;;  %v385_v17 = vrot.slane %v383_v10, 5  ;;  %v599_v27 = vrot.slane %v597_v14, 4  ;;  %v531_v44 = vld [vmem:[%s2508_s24 + $0x3c] sm:$0xe] }
  0x25   : > { %v291_v19 = vrot.slane %v290_v11, 4  ;;  %v396_v20 = vor.u32 %v395_v12, %v391_v5  ;;  %v576_v28 = vrot.slane %v520_v18, 5  ;;  %v2125_v34 = vrot.slane %v528_v24, 9  ;;  %v2147_v53 = vld [vmem:[%s2508_s24 + $0xc] sm:$0xf] }
  0x26   : > { %457 = vrot.lane.b32.xlu1 %v306_v15, %s2442_s26  ;;  %v386_v22 = vor.u32 %v385_v17, %v382_v16  ;;  %v601_v37 = vsel %vm2510_vm2, %v599_v27, %v600_v23  ;;  %v579_v39 = vrot.slane %v521_v30, 5  ;;  %v604_v40 = vrot.slane %v532_v31, 5  ;;  %v2132_v56 = vld [vmem:[%s2508_s24 + $0x10] sm:$0xf]  ;;  %v2160_v57 = vld [vmem:[%s2508_s24 + $0x40] sm:$0xf] }
  0x27   : > { %v296_v25 = vsel %vm2532_vm5, %v291_v19, %v295_v51  ;;  %v397_v26 = vrot.slane %v396_v20, 4  ;;  %v578_v38 = vrot.slane %v576_v28, 4  ;;  %v598_v42 = vsel %vm2510_vm2, %v2125_v34, %v597_v14  ;;  %v2148_v51 = vld [vmem:[%s2508_s24 + $0x10] sm:$0xf]  ;;  %v2131_v60 = vld [vmem:[%s2508_s24 + $0xc] sm:$0xf] }
  0x28   : > { %455 = vrot.lane.b32.xlu0 %v296_v25, %s2442_s26  ;;  %v387_v29 = vrot.slane %v386_v22, 4  ;;  %v2122_v43 = vrot.slane %v519_v36, 9  ;;  %v606_v46 = vrot.slane %v604_v40, 4  ;;  %v607_v47 = vrot.slane %v533_v41, 5  ;;  %v2159_v61 = vld [vmem:[%s2508_s24 + $0x3c] sm:$0xf] }
  0x29   : > { %v402_v33 = vsel %vm2532_vm5, %v397_v26, %v401_v21  ;;  %v580_v45 = vsel %vm2510_vm2, %v578_v38, %v579_v39  ;;  %v2126_v49 = vrot.slane %v531_v44, 9  ;;  %v823_v54 = vshll.u32 %v2148_v51, 16  ;;  %v2140_v3 = vld [vmem:[%s2508_s24 + $0x40] sm:$0xf]  ;;  %v2149_v4 = vld [vmem:[%s2508_s24 + $0x14] sm:$0x1] }
  0x2a   : > { %473 = vrot.lane.b32.xlu1 %v402_v33, %s2442_s26  ;;  %v392_v35 = vsel %vm2532_vm5, %v387_v29, %v391_v5  ;;  %v577_v48 = vsel %vm2510_vm2, %v2122_v43, %v576_v28  ;;  %v608_v50 = vsel %vm2510_vm2, %v606_v46, %v607_v47  ;;  %v827_v55 = vshrl.u32 %v2148_v51, 16  ;;  %v2151_v9 = vld [vmem:[%s2508_s24 + $0x1c] sm:$0xf]  ;;  %v2150_v15 = vld [vmem:[%s2508_s24 + $0x18] sm:$0xf] }
  0x2b   : > { %v605_v52 = vsel %vm2510_vm2, %v2126_v49, %v604_v40  ;;  %v814_v58 = vshrl.u32 %v2147_v53, 16  ;;  %v817_v59 = vshll.u32 %v2147_v53, 16  ;;  %v2599_v62 = vrot.slane %v823_v54, 5  ;;  %v2139_v10 = vld [vmem:[%s2508_s24 + $0x3c] sm:$0xf] }
  0x2c   : > { %471 = vrot.lane.b32.xlu0 %v392_v35, %s2442_s26  ;;  %v829_v63 = vrot.slane %v827_v55, 4  ;;  %v919_v1 = vshll.u32 %v2160_v57, 16  ;;  %v923_v2 = vshrl.u32 %v2160_v57, 16  ;;  %v910_v7 = vshrl.u32 %v2159_v61, 16  ;;  %v2134_v16 = vld [vmem:[%s2508_s24 + $0x1c] sm:$0xf] }
  0x2d   : > { %v816_v5 = vrot.slane %v814_v58, 4  ;;  %v819_v6 = vrot.slane %v817_v59, 5  ;;  %v913_v8 = vshll.u32 %v2159_v61, 16  ;;  %v833_v12 = vshll.u32 %v2149_v4, 16  ;;  %v2161_v17 = vld [vmem:[%s2508_s24 + $0x44] sm:$0x1] }
  0x2e   : > { %641 = vrot.lane.b32.xlu1 %v601_v37, %s2441_s25  ;;  %v830_v11 = vor.u32 %v829_v63, %v2599_v62  ;;  %v2608_v13 = vrot.slane %v919_v1, 5  ;;  %v925_v14 = vrot.slane %v923_v2, 4  ;;  %v847_v18 = vshll.u32 %v2151_v9, 16  ;;  %v2163_v23 = vld [vmem:[%s2508_s24 + $0x4c] sm:$0xf] }
  0x2f   : > { %v851_v19 = vshrl.u32 %v2151_v9, 16  ;;  %v820_v20 = vor.u32 %v819_v6, %v816_v5  ;;  %v912_v21 = vrot.slane %v910_v7, 4  ;;  %v915_v22 = vrot.slane %v913_v8, 5  ;;  %v2133_v24 = vld [vmem:[%s2508_s24 + $0x18] sm:$0xf] }
  0x30   : > { %639 = vrot.lane.b32.xlu0 %v598_v42, %s2441_s25  ;;  %v2142_v25 = vld [vmem:[%s2508_s24 + $0x4c] sm:$0xf]  ;;  %v838_v26 = vshrl.u32 %v2150_v15, 16  ;;  %v841_v27 = vshll.u32 %v2150_v15, 16  ;;  %v831_v28 = vrot.slane %v830_v11, 4  ;;  %v835_v29 = vrot.slane %v833_v12, 5 }
  0x31   : > { %v926_v30 = vor.u32 %v925_v14, %v2608_v13  ;;  %v929_v31 = vshll.u32 %v2161_v17, 16  ;;  %v2162_v33 = vld [vmem:[%s2508_s24 + $0x48] sm:$0xf]  ;;  %v2152_v34 = vld [vmem:[%s2508_s24 + $0x20] sm:$0x1]  ;;  %v849_v35 = vrot.slane %v847_v18, 5  ;;  %v916_v40 = vor.u32 %v915_v22, %v912_v21 }
  0x32   : > { %629 = vrot.lane.b32.xlu1 %v580_v45, %s2441_s25  ;;  %v853_v36 = vrot.slane %v851_v19, 4  ;;  %v943_v37 = vshll.u32 %v2163_v23, 16  ;;  %v947_v38 = vshrl.u32 %v2163_v23, 16  ;;  %v821_v39 = vrot.slane %v820_v20, 4  ;;  %v2141_v41 = vld [vmem:[%s2508_s24 + $0x48] sm:$0xf] }
  0x33   : > { %v840_v42 = vrot.slane %v838_v26, 4  ;;  %v843_v43 = vrot.slane %v841_v27, 5  ;;  %v934_v44 = vshrl.u32 %v2162_v33, 16  ;;  %v937_v45 = vshll.u32 %v2162_v33, 16  ;;  %v2164_v54 = vld [vmem:[%s2508_s24 + $0x50] sm:$0x1] }
  0x34   : > { %627 = vrot.lane.b32.xlu0 %v577_v48, %s2441_s25  ;;  %v836_v46 = vsel %vm2532_vm5, %v831_v28, %v835_v29  ;;  %v931_v47 = vrot.slane %v929_v31, 5  ;;  %v857_v48 = vshll.u32 %v2152_v34, 16  ;;  %v927_v49 = vrot.slane %v926_v30, 4  ;;  %v2173_v9 = vld [vmem:[%s2508_s24 + $0x14] sm:$0x1] }
  0x35   : > { %v945_v51 = vrot.slane %v943_v37, 5  ;;  %v826_v53 = vsel %vm2532_vm5, %v821_v39, %v2599_v62  ;;  %v917_v55 = vrot.slane %v916_v40, 4  ;;  %v936_v57 = vrot.slane %v934_v44, 4  ;;  %v2172_v62 = vld [vmem:[%s2508_s24 + $0x10] sm:$0xf] }
  0x36   : > { %645 = vrot.lane.b32.xlu1 %v608_v50, %s2441_s25  ;;  %v854_v50 = vor.u32 %v853_v36, %v849_v35  ;;  %v939_v58 = vrot.slane %v937_v45, 5  ;;  %v859_v59 = vrot.slane %v857_v48, 5  ;;  %v953_v1 = vshll.u32 %v2164_v54, 16  ;;  %v2171_v14 = vld [vmem:[%s2508_s24 + $0xc] sm:$0xe] }
  0x37   : > { %v922_v2 = vsel %vm2532_vm5, %v917_v55, %v2608_v13  ;;  %v1120_v8 = vrot.slane %v2172_v62, 5  ;;  %v207_v13 = vld [vmem:[%s2508_s24 + $0x30] sm:$0xf]  ;;  %v199_v15 = vld [vmem:[%s2508_s24] sm:$0xf]  ;;  %v1123_v18 = vrot.slane %v2173_v9, 5 }
  0x38   : > { %643 = vrot.lane.b32.xlu0 %v605_v52, %s2441_s25  ;;  %v949_v52 = vrot.slane %v947_v38, 4  ;;  %v855_v61 = vrot.slane %v854_v50, 4  ;;  %v940_v4 = vor.u32 %v939_v58, %v936_v57  ;;  %v955_v7 = vrot.slane %v953_v1, 5  ;;  %224 = vst.msk [vmem:[#allocation2 + $0x20] sm:$0xf] %vm215_vm6, %v207_v13 }
  0x39   : > { %v1122_v17 = vrot.slane %v1120_v8, 4  ;;  %216 = vst.msk [vmem:[#allocation2] sm:$0xf] %vm215_vm6, %v199_v15  ;;  %v2185_v20 = vld [vmem:[%s2508_s24 + $0x44] sm:$0x1]  ;;  %v2195_v23 = vrot.slane %v2171_v14, 9 }
  0x3a   : > { %726 = vrot.lane.b32.xlu1 %v2132_v56, %s2443_s27  ;;  %v844_v56 = vor.u32 %v843_v43, %v840_v42  ;;  %v950_v63 = vor.u32 %v949_v52, %v945_v51  ;;  %v860_v5 = vsel %vm2532_vm5, %v855_v61, %v859_v59  ;;  %v941_v12 = vrot.slane %v940_v4, 4  ;;  %v2175_v21 = vld [vmem:[%s2508_s24 + $0x1c] sm:$0xf]  ;;  %v2176_v31 = vld [vmem:[%s2508_s24 + $0x20] sm:$0x1] }
  0x3b   : > { %v2183_v26 = vld [vmem:[%s2508_s24 + $0x3c] sm:$0xe]  ;;  %v1124_v27 = vsel %vm2510_vm2, %v1122_v17, %v1123_v18  ;;  %v1151_v29 = vrot.slane %v2185_v20, 5  ;;  %v1127_v30 = vrot.slane %v2175_v21, 5  ;;  %v2187_v33 = vld [vmem:[%s2508_s24 + $0x4c] sm:$0xf]  ;;  %v1121_v34 = vsel %vm2510_vm2, %v2195_v23, %v1120_v8 }
  0x3c   : > { %724 = vrot.lane.b32.xlu0 %v2131_v60, %s2443_s27  ;;  %v932_v60 = vsel %vm2532_vm5, %v927_v49, %v931_v47  ;;  %v951_v6 = vrot.slane %v950_v63, 4  ;;  %v946_v22 = vsel %vm2532_vm5, %v941_v12, %v945_v51  ;;  %v202_v36 = vld [vmem:[%s2508_s24 + $0x10] sm:$0xf]  ;;  %v2174_v37 = vld [vmem:[%s2508_s24 + $0x18] sm:$0xe]  ;;  %v1155_v42 = vrot.slane %v2187_v33, 5 }
  0x3d   : > { %219 = vst.msk [vmem:[#allocation2 + $0xc] sm:$0xf] %vm215_vm6, %v202_v36  ;;  %v201_v38 = vld [vmem:[%s2508_s24 + $0xc] sm:$0xf]  ;;  %v1129_v40 = vrot.slane %v1127_v30, 4  ;;  %v2196_v45 = vrot.slane %v2174_v37, 9 }
  0x3e   : > { %742 = vrot.lane.b32.xlu1 %v2140_v3, %s2443_s27  ;;  %v845_v3 = vrot.slane %v844_v56, 4  ;;  %218 = vst.msk [vmem:[#allocation2 + $0x8] sm:$0xf] %vm215_vm6, %v201_v38  ;;  %v2188_v43 = vld [vmem:[%s2508_s24 + $0x50] sm:$0x1]  ;;  %v1157_v50 = vrot.slane %v1155_v42, 4 }
  0x3f   : > { %v2186_v47 = vld [vmem:[%s2508_s24 + $0x48] sm:$0xe]  ;;  %v209_v48 = vld [vmem:[%s2508_s24 + $0x3c] sm:$0xf]  ;;  %v1158_v51 = vrot.slane %v2188_v43, 5  ;;  %v1128_v52 = vsel %vm2510_vm2, %v2196_v45, %v1127_v30 }
  0x40   : > { %740 = vrot.lane.b32.xlu0 %v2139_v10, %s2443_s27  ;;  %v2184_v10 = vld [vmem:[%s2508_s24 + $0x40] sm:$0xf]  ;;  %v850_v11 = vsel %vm2532_vm5, %v845_v3, %v849_v35  ;;  %v2199_v35 = vrot.slane %v2183_v26, 9  ;;  %226 = vst.msk [vmem:[#allocation2 + $0x28] sm:$0xf] %vm215_vm6, %v209_v48 }
  0x41   : > { %v1148_v19 = vrot.slane %v2184_v10, 5  ;;  %v1159_v54 = vsel %vm2510_vm2, %v1157_v50, %v1158_v51  ;;  %v2222_v55 = vld [vmem:[%s2508_s24 + $0x1c] sm:$0xf]  ;;  %v2221_v57 = vld [vmem:[%s2508_s24 + $0x18] sm:$0xf] }
  0x42   : > { %730 = vrot.lane.b32.xlu1 %v2134_v16, %s2443_s27  ;;  %v956_v16 = vsel %vm2532_vm5, %v951_v6, %v955_v7  ;;  %v1374_v58 = vshll.u32 %v2222_v55, 16  ;;  %v1378_v59 = vshrl.u32 %v2222_v55, 16  ;;  %v2234_v61 = vld [vmem:[%s2508_s24 + $0x4c] sm:$0xf]  ;;  %v1365_v63 = vshrl.u32 %v2221_v57, 16 }
  0x43   : > { %v1150_v28 = vrot.slane %v1148_v19, 4  ;;  %v1149_v44 = vsel %vm2510_vm2, %v2199_v35, %v1148_v19  ;;  %v1368_v1 = vshll.u32 %v2221_v57, 16  ;;  %v2205_v62 = vld [vmem:[%s2508_s24 + $0x18] sm:$0xf]  ;;  %v1474_v6 = vshrl.u32 %v2234_v61, 16 }
  0x44   : > { %728 = vrot.lane.b32.xlu0 %v2133_v24, %s2443_s27  ;;  %v208_v24 = vld [vmem:[%s2508_s24 + $0x34] sm:$0xf]  ;;  %v2711_v3 = vrot.slane %v1374_v58, 5  ;;  %v1380_v4 = vrot.slane %v1378_v59, 4  ;;  %v2214_v7 = vld [vmem:[%s2508_s24 + $0x4c] sm:$0xf] }
  0x45   : > { %225 = vst.msk [vmem:[#allocation2 + $0x24] sm:$0xf] %vm215_vm6, %v208_v24  ;;  %v1152_v39 = vsel %vm2510_vm2, %v1150_v28, %v1151_v29  ;;  %v2223_v8 = vld [vmem:[%s2508_s24 + $0x20] sm:$0x1]  ;;  %v1367_v9 = vrot.slane %v1365_v63, 4  ;;  %v1370_v10 = vrot.slane %v1368_v1, 5 }
  0x46   : > { %746 = vrot.lane.b32.xlu1 %v2142_v25, %s2443_s27  ;;  %v200_v25 = vld [vmem:[%s2508_s24 + $0x4] sm:$0xf]  ;;  %v2225_v13 = vld [vmem:[%s2508_s24 + $0x28] sm:$0xf]  ;;  %v1381_v15 = vor.u32 %v1380_v4, %v2711_v3  ;;  %v1476_v18 = vrot.slane %v1474_v6, 4 }
  0x47   : > { %217 = vst.msk [vmem:[#allocation2 + $0x4] sm:$0xf] %vm215_vm6, %v200_v25  ;;  %v2213_v14 = vld [vmem:[%s2508_s24 + $0x48] sm:$0xf]  ;;  %v2224_v19 = vld [vmem:[%s2508_s24 + $0x24] sm:$0xf]  ;;  %v1371_v24 = vor.u32 %v1370_v10, %v1367_v9 }
  0x48   : > { %744 = vrot.lane.b32.xlu0 %v2141_v41, %s2443_s27  ;;  %v1130_v41 = vrot.slane %v2176_v31, 5  ;;  %v2208_v20 = vld [vmem:[%s2508_s24 + $0x28] sm:$0xf]  ;;  %v2235_v21 = vld [vmem:[%s2508_s24 + $0x50] sm:$0x1]  ;;  %v1402_v23 = vshrl.u32 %v2225_v13, 16 }
  0x49   : > { %v2207_v28 = vld [vmem:[%s2508_s24 + $0x24] sm:$0xf]  ;;  %v2216_v29 = vld [vmem:[%s2508_s24 + $0x58] sm:$0xf]  ;;  %v1389_v30 = vshrl.u32 %v2224_v19, 16  ;;  %v1392_v31 = vshll.u32 %v2224_v19, 16 }
  0x4a   : > { %1007 = vrot.lane.b32.xlu1 %v836_v46, %s2444_s28  ;;  %v210_v46 = vld [vmem:[%s2508_s24 + $0x40] sm:$0xf]  ;;  %v1131_v49 = vsel %vm2510_vm2, %v1129_v40, %v1130_v41  ;;  %v1382_v33 = vrot.slane %v1381_v15, 4  ;;  %v1480_v36 = vshll.u32 %v2235_v21, 16  ;;  %v2236_v37 = vld [vmem:[%s2508_s24 + $0x54] sm:$0xf] }
  0x4b   : > { %227 = vst.msk [vmem:[#allocation2 + $0x2c] sm:$0xf] %vm215_vm6, %v210_v46  ;;  %v2226_v38 = vld [vmem:[%s2508_s24 + $0x2c] sm:$0x1]  ;;  %v1404_v40 = vrot.slane %v1402_v23, 4  ;;  %v1372_v43 = vrot.slane %v1371_v24, 4 }
  0x4c   : > { %1005 = vrot.lane.b32.xlu0 %v826_v53, %s2444_s28  ;;  %v2200_v53 = vrot.slane %v2186_v47, 9  ;;  %v2215_v45 = vld [vmem:[%s2508_s24 + $0x54] sm:$0xf]  ;;  %v1391_v46 = vrot.slane %v1389_v30, 4  ;;  %v1394_v47 = vrot.slane %v1392_v31, 5  ;;  %v1485_v48 = vshrl.u32 %v2236_v37, 16 }
  0x4d   : > { %v1482_v51 = vrot.slane %v1480_v36, 5  ;;  %v2238_v55 = vld [vmem:[%s2508_s24 + $0x5c] sm:$0x1]  ;;  %v1377_v58 = vsel %vm2532_vm5, %v1372_v43, %v2711_v3  ;;  %v251_v19 = vld [vmem:[%s2508_s24 + $0x4c] sm:$0xf] }
  0x4e   : > { %1023 = vrot.lane.b32.xlu1 %v932_v60, %s2444_s28  ;;  %v1156_v56 = vsel %vm2510_vm2, %v2200_v53, %v1155_v42  ;;  %v2206_v60 = vld [vmem:[%s2508_s24 + $0x1c] sm:$0xf]  ;;  %v1504_v1 = vshll.u32 %v2238_v55, 16  ;;  %v250_v24 = vld [vmem:[%s2508_s24 + $0x48] sm:$0xf] }
  0x4f   : > { %v2246_v6 = vld [vmem:[%s2508_s24 + $0x1c] sm:$0xf]  ;;  %v2259_v31 = vld [vmem:[%s2508_s24 + $0x50] sm:$0x1]  ;;  %v240_v36 = vld [vmem:[%s2508_s24 + $0x20] sm:$0x1] }
  0x50   : > { %1021 = vrot.lane.b32.xlu0 %v922_v2, %s2444_s28  ;;  %v2233_v2 = vld [vmem:[%s2508_s24 + $0x48] sm:$0xf]  ;;  %v239_v3 = vld [vmem:[%s2508_s24 + $0x1c] sm:$0xf]  ;;  %v1506_v10 = vrot.slane %v1504_v1, 5 }
  0x51   : > { %v1464_v12 = vshll.u32 %v2233_v2, 16  ;;  %v2800_v1 = vld [vmem:[%s2508_s24 + $0x28] sm:$0xf] }
  0x52   : > { %1011 = vrot.lane.b32.xlu1 %v860_v5, %s2444_s28  ;;  %v1470_v5 = vshll.u32 %v2234_v61, 16  ;;  %v1487_v61 = vrot.slane %v1485_v48, 4 }
  0x53   : > { %v1466_v26 = vrot.slane %v1464_v12, 5  ;;  %v1671_v12 = vrot.slane %v2246_v6, 5 }
  0x54   : > { %1009 = vrot.lane.b32.xlu0 %v850_v11, %s2444_s28  ;;  %v1461_v11 = vshrl.u32 %v2233_v2, 16  ;;  %v2720_v17 = vrot.slane %v1470_v5, 5 }
  0x56   : > { %1027 = vrot.lane.b32.xlu1 %v956_v16, %s2444_s28  ;;  %v1384_v16 = vshll.u32 %v2223_v8, 16  ;;  %v1463_v25 = vrot.slane %v1461_v11, 4  ;;  %v1477_v35 = vor.u32 %v1476_v18, %v2720_v17  ;;  %v2247_v11 = vld [vmem:[%s2508_s24 + $0x20] sm:$0x1]  ;;  %v321_v18 = vshrl.u32 %v239_v3, 16 }
  0x58   : > { %1025 = vrot.lane.b32.xlu0 %v946_v22, %s2444_s28  ;;  %v1398_v22 = vshll.u32 %v2225_v13, 16  ;;  %v1478_v53 = vrot.slane %v1477_v35, 4  ;;  %v238_v13 = vld [vmem:[%s2508_s24 + $0x18] sm:$0xf]  ;;  %v323_v35 = vrot.slane %v321_v18, 4 }
  0x59   : > { %v311_v23 = vshll.u32 %v238_v13, 16 }
  0x5a   : > { %1176 = vrot.lane.b32.xlu1 %v1124_v27, %s2445_s29  ;;  %v2237_v27 = vld [vmem:[%s2508_s24 + $0x58] sm:$0xf] }
  0x5b   : > { %v1494_v41 = vshll.u32 %v2237_v27, 16  ;;  %v1498_v42 = vshrl.u32 %v2237_v27, 16  ;;  %v2245_v27 = vld [vmem:[%s2508_s24 + $0x18] sm:$0xe]  ;;  %v313_v43 = vrot.slane %v311_v23, 5 }
  0x5c   : > { %1174 = vrot.lane.b32.xlu0 %v1121_v34, %s2445_s29  ;;  %v1386_v34 = vrot.slane %v1384_v16, 5  ;;  %v317_v16 = vshll.u32 %v239_v3, 16 }
  0x5d   : > { %v1500_v57 = vrot.slane %v1498_v42, 4 }
  0x5e   : > { %1192 = vrot.lane.b32.xlu1 %v1152_v39, %s2445_s29  ;;  %v2733_v39 = vrot.slane %v1398_v22, 5  ;;  %v1387_v50 = vsel %vm2532_vm5, %v1382_v33, %v1386_v34  ;;  %v308_v22 = vshrl.u32 %v238_v13, 16  ;;  %v2775_v34 = vrot.slane %v317_v16, 5  ;;  %v2814_v13 = vld [vmem:[%s2508_s24 + $0x58] sm:$0xf] }
  0x60   : > { %1190 = vrot.lane.b32.xlu0 %v1149_v44, %s2445_s29  ;;  %v1467_v44 = vor.u32 %v1466_v26, %v1463_v25  ;;  %v1673_v25 = vrot.slane %v1671_v12, 4  ;;  %v1674_v26 = vrot.slane %v2247_v11, 5  ;;  %v310_v42 = vrot.slane %v308_v22, 4 }
  0x62   : > { %1180 = vrot.lane.b32.xlu1 %v1131_v49, %s2445_s29  ;;  %v1488_v49 = vshll.u32 %v2236_v37, 16  ;;  %v1468_v59 = vrot.slane %v1467_v44, 4  ;;  %v404_v37 = vshrl.u32 %v250_v24, 16  ;;  %v1702_v44 = vrot.slane %v2259_v31, 5 }
  0x63   : > { %v1675_v48 = vsel %vm2510_vm2, %v1673_v25, %v1674_v26 }
  0x64   : > { %1178 = vrot.lane.b32.xlu0 %v1128_v52, %s2445_s29  ;;  %v1408_v52 = vshll.u32 %v2226_v38, 16  ;;  %v1490_v63 = vrot.slane %v1488_v49, 5  ;;  %v407_v38 = vshll.u32 %v250_v24, 16  ;;  %v203_v24 = vld [vmem:[%s2508_s24 + $0x18] sm:$0xf] }
  0x65   : > { %220 = vst.msk [vmem:[#allocation2 + $0x10] sm:$0xf] %vm215_vm6, %v203_v24  ;;  %v535_v24 = vld [vmem:[%s2508_s24 + $0x4c] sm:$0xf] }
  0x66   : > { %1196 = vrot.lane.b32.xlu1 %v1159_v54, %s2445_s29  ;;  %v1405_v54 = vor.u32 %v1404_v40, %v2733_v39  ;;  %v1410_v4 = vrot.slane %v1408_v52, 5  ;;  %v1491_v9 = vor.u32 %v1490_v63, %v1487_v61  ;;  %v2269_v40 = vrot.slane %v2245_v27, 9 }
  0x67   : > { %v406_v52 = vrot.slane %v404_v37, 4 }
  0x68   : > { %1194 = vrot.lane.b32.xlu0 %v1156_v56, %s2445_s29  ;;  %v2742_v56 = vrot.slane %v1494_v41, 5  ;;  %v1406_v2 = vrot.slane %v1405_v54, 4  ;;  %v1492_v21 = vrot.slane %v1491_v9, 4  ;;  %v2257_v41 = vld [vmem:[%s2508_s24 + $0x48] sm:$0xe]  ;;  %v1672_v54 = vsel %vm2510_vm2, %v2269_v40, %v1671_v12 }
  0x69   : > { %v2273_v55 = vrot.slane %v2257_v41, 9  ;;  %v1678_v9 = vrot.slane %v2800_v1, 5  ;;  %v2248_v12 = vld [vmem:[%s2508_s24 + $0x24] sm:$0xe]  ;;  %v243_v40 = vld [vmem:[%s2508_s24 + $0x2c] sm:$0x1] }
  0x6a   : > { %1277 = vrot.lane.b32.xlu1 %v2206_v60, %s2446_s30  ;;  %v1395_v60 = vor.u32 %v1394_v47, %v1391_v46  ;;  %v1501_v5 = vor.u32 %v1500_v57, %v2742_v56  ;;  %v211_v41 = vld [vmem:[%s2508_s24 + $0x48] sm:$0xf] }
  0x6b   : > { %v1680_v27 = vrot.slane %v1678_v9, 4  ;;  %228 = vst.msk [vmem:[#allocation2 + $0x30] sm:$0xf] %vm215_vm6, %v211_v41  ;;  %v534_v41 = vld [vmem:[%s2508_s24 + $0x48] sm:$0xe] }
  0x6c   : > { %1275 = vrot.lane.b32.xlu0 %v2205_v62, %s2446_s30  ;;  %v1483_v62 = vsel %vm2532_vm5, %v1478_v53, %v1482_v51  ;;  %v1396_v8 = vrot.slane %v1395_v60, 4  ;;  %v1502_v15 = vrot.slane %v1501_v5, 4  ;;  %v327_v51 = vshll.u32 %v240_v36, 16  ;;  %v212_v36 = vld [vmem:[%s2508_s24 + $0x4c] sm:$0xf] }
  0x6d   : > { %v409_v53 = vrot.slane %v407_v38, 5  ;;  %229 = vst.msk [vmem:[#allocation2 + $0x34] sm:$0xf] %vm215_vm6, %v212_v36  ;;  %v536_v36 = vld [vmem:[%s2508_s24 + $0x50] sm:$0x1] }
  0x6e   : > { %1293 = vrot.lane.b32.xlu1 %v2214_v7, %s2446_s30  ;;  %v1473_v7 = vsel %vm2532_vm5, %v1468_v59, %v2720_v17  ;;  %v2258_v17 = vld [vmem:[%s2508_s24 + $0x4c] sm:$0xf]  ;;  %v1507_v30 = vsel %vm2532_vm5, %v1502_v15, %v1506_v10  ;;  %v329_v63 = vrot.slane %v327_v51, 5  ;;  %v241_v10 = vld [vmem:[%s2508_s24 + $0x24] sm:$0xf] }
  0x6f   : > { %v1699_v33 = vrot.slane %v2258_v17, 5  ;;  %v204_v17 = vld [vmem:[%s2508_s24 + $0x1c] sm:$0xf]  ;;  %v332_v22 = vshrl.u32 %v241_v10, 16  ;;  %v335_v23 = vshll.u32 %v241_v10, 16  ;;  %v2394_v10 = vld [vmem:[%s3327_s1] sm:$0xff]  }
  0x70   : > { %1291 = vrot.lane.b32.xlu0 %v2213_v14, %s2446_s30  ;;  %v1411_v14 = vsel %vm2532_vm5, %v1406_v2, %v1410_v4  ;;  %v410_v2 = vor.u32 %v409_v53, %v406_v52  ;;  %v242_v4 = vld [vmem:[%s2508_s24 + $0x28] sm:$0xf]  ;;  %221 = vst.msk [vmem:[#allocation2 + $0x14] sm:$0xf] %vm215_vm6, %v204_v17  ;;  %v351_v52 = vshll.u32 %v243_v40, 16 }
  0x71   : > { %v1701_v49 = vrot.slane %v1699_v33, 4  ;;  %v1700_v5 = vsel %vm2510_vm2, %v2273_v55, %v1699_v33  ;;  %v345_v15 = vshrl.u32 %v242_v4, 16  ;;  %v2391_v55 = vld [vmem:[%s3327_s1 + $0x10] ss:$0 sps:$4 sm:$0x33]  }
  0x72   : > { %1281 = vrot.lane.b32.xlu1 %v2208_v20, %s2446_s30  ;;  %v1401_v20 = vsel %vm2532_vm5, %v1396_v8, %v2733_v39  ;;  %v1497_v39 = vsel %vm2532_vm5, %v1492_v21, %v2742_v56  ;;  %v314_v56 = vor.u32 %v313_v43, %v310_v42  ;;  %v2250_v8 = vld [vmem:[%s2508_s24 + $0x2c] sm:$0x1]  ;;  %v411_v18 = vrot.slane %v410_v2, 4  ;;  %v2260_v42 = vld [vmem:[%s2508_s24 + $0x54] sm:$0xe]  ;;  %2339 = vmatprep.subr.msk.bf16.mxu0 %vm1898_vm9, %v2391_v55 }
  0x73   : > { %v1703_v60 = vsel %vm2510_vm2, %v1701_v49, %v1702_v44  ;;  %v1681_v21 = vrot.slane %v2250_v8, 5  ;;  %v347_v33 = vrot.slane %v345_v15, 4  ;;  %v334_v43 = vrot.slane %v332_v22, 4  ;;  %2340 = vmatprep.subr.msk.bf16.mxu1 %vm1898_vm9, %v2391_v55  ;;  %v206_v15 = vld [vmem:[%s2508_s24 + $0x28] sm:$0xf] }
  0x74   : > { %1279 = vrot.lane.b32.xlu0 %v2207_v28, %s2446_s30  ;;  %v413_v28 = vshll.u32 %v251_v19, 16  ;;  %v315_v6 = vrot.slane %v314_v56, 4  ;;  %v337_v44 = vrot.slane %v335_v23, 5  ;;  %223 = vst.msk [vmem:[#allocation2 + $0x1c] sm:$0xf] %vm215_vm6, %v206_v15 }
  0x75   : > { %v524_v23 = vld [vmem:[%s2508_s24 + $0x20] sm:$0x1] }
  0x76   : > { %1297 = vrot.lane.b32.xlu1 %v2216_v29, %s2446_s30  ;;  %v417_v29 = vshrl.u32 %v251_v19, 16  ;;  %v2785_v46 = vrot.slane %v413_v28, 5  ;;  %v254_v19 = vld [vmem:[%s2508_s24 + $0x58] sm:$0xf]  ;;  %v2262_v28 = vld [vmem:[%s2508_s24 + $0x5c] sm:$0x1] }
  0x78   : > { %1295 = vrot.lane.b32.xlu0 %v2215_v45, %s2446_s30  ;;  %v252_v45 = vld [vmem:[%s2508_s24 + $0x50] sm:$0x1]  ;;  %v419_v47 = vrot.slane %v417_v29, 4  ;;  %v1706_v29 = vrot.slane %v2814_v13, 5  ;;  %v416_v38 = vsel %vm2532_vm5, %v411_v18, %v2785_v46 }
  0x79   : > { %v423_v57 = vshll.u32 %v252_v45, 16 }
  0x7a   : > { %1558 = vrot.lane.b32.xlu1 %v1387_v50, %s2447_s4  ;;  %v324_v50 = vor.u32 %v323_v35, %v2775_v34  ;;  %v441_v35 = vshrl.u32 %v254_v19, 16  ;;  %v1708_v49 = vrot.slane %v1706_v29, 4 }
  0x7b   : > { %v425_v3 = vrot.slane %v423_v57, 5 }
  0x7c   : > { %1556 = vrot.lane.b32.xlu0 %v1377_v58, %s2447_s4  ;;  %v420_v58 = vor.u32 %v419_v47, %v2785_v46  ;;  %v325_v61 = vrot.slane %v324_v50, 4  ;;  %v1682_v46 = vsel %vm2510_vm2, %v1680_v27, %v1681_v21  ;;  %v1709_v50 = vrot.slane %v2262_v28, 5  ;;  %v214_v21 = vld [vmem:[%s2508_s24 + $0x58] sm:$0xf] }
  0x7d   : > { %231 = vst.msk [vmem:[#allocation2 + $0x3c] sm:$0xf] %vm215_vm6, %v214_v21  ;;  %v2165_v21 = vld [vmem:[%s2508_s24 + $0x54] sm:$0xf] }
  0x7e   : > { %1574 = vrot.lane.b32.xlu1 %v1483_v62, %s2447_s4  ;;  %v330_v11 = vsel %vm2532_vm5, %v325_v61, %v329_v63  ;;  %v2393_v61 = vld [vmem:[%s3327_s1 + $0x8] sm:$0xff]   ;;  %v338_v63 = vor.u32 %v337_v44, %v334_v43  ;;  %v614_v44 = vrot.slane %v536_v36, 5  ;;  %v2143_v36 = vld [vmem:[%s2508_s24 + $0x54] sm:$0xf] }
  0x80   : > { %1572 = vrot.lane.b32.xlu0 %v1473_v7, %s2447_s4  ;;  %v421_v7 = vrot.slane %v420_v58, 4  ;;  %v2274_v58 = vrot.slane %v2260_v42, 9 }
  0x82   : > { %1562 = vrot.lane.b32.xlu1 %v1411_v14, %s2447_s4  ;;  %v341_v14 = vshll.u32 %v242_v4, 16  ;;  %v426_v26 = vsel %vm2532_vm5, %v421_v7, %v425_v3  ;;  %v1710_v4 = vsel %vm2510_vm2, %v1708_v49, %v1709_v50  ;;  %v2127_v50 = vrot.slane %v534_v41, 9 }
  0x84   : > { %1560 = vrot.lane.b32.xlu0 %v1401_v20, %s2447_s4  ;;  %v320_v20 = vsel %vm2532_vm5, %v315_v6, %v2775_v34  ;;  %v2835_v31 = vrot.slane %v341_v14, 5  ;;  %v437_v34 = vshll.u32 %v254_v19, 16  ;;  %v353_v6 = vrot.slane %v351_v52, 5  ;;  %v525_v52 = vld [vmem:[%s2508_s24 + $0x24] sm:$0xe] }
  0x86   : > { %1578 = vrot.lane.b32.xlu1 %v1507_v30, %s2447_s4  ;;  %v253_v30 = vld [vmem:[%s2508_s24 + $0x54] sm:$0xf]  ;;  %v348_v51 = vor.u32 %v347_v33, %v2835_v31  ;;  %v2856_v53 = vrot.slane %v437_v34, 5  ;;  %v586_v34 = vrot.slane %v524_v23, 5 }
  0x87   : > { %v428_v45 = vshrl.u32 %v253_v30, 16  ;;  %v431_v47 = vshll.u32 %v253_v30, 16 }
  0x88   : > { %1576 = vrot.lane.b32.xlu0 %v1497_v39, %s2447_s4  ;;  %v2270_v39 = vrot.slane %v2248_v12, 9  ;;  %v339_v12 = vrot.slane %v338_v63, 4 }
  0x89   : > { %v624_v62 = vpop.permute.xlu0 %623  ;;  %v433_v2 = vrot.slane %v431_v47, 5 }
  0x8a   : > { %1727 = vrot.lane.b32.xlu1 %v1675_v48, %s2448_s5  ;;  %v1679_v57 = vsel %vm2510_vm2, %v2270_v39, %v1678_v9  ;;  %v2880_v9 = vld [vmem:[%s2508_s24 + $0x1c] sm:$0xf] }
  0x8b   : > { %v2795_v59 = vpop.permute.xlu1 %625 }
  0x8c   : > { %1725 = vrot.lane.b32.xlu0 %v1672_v54, %s2448_s5  ;;  %v443_v54 = vrot.slane %v441_v35, 4 }
  0x8e   : > { %1743 = vrot.lane.b32.xlu1 %v1703_v60, %s2448_s5  ;;  %v255_v60 = vld [vmem:[%s2508_s24 + $0x5c] sm:$0x1]  ;;  %v444_v3 = vor.u32 %v443_v54, %v2856_v53 }
  0x8f   : > { %v447_v7 = vshll.u32 %v255_v60, 16 }
  0x90   : > { %1741 = vrot.lane.b32.xlu0 %v1700_v5, %s2448_s5  ;;  %v468_v16 = vpop.permute.xlu1 %467  ;;  %v349_v5 = vrot.slane %v348_v51, 4  ;;  %v445_v19 = vrot.slane %v444_v3, 4 }
  0x91   : > { %508 = vst.msk [vmem:[#allocation2 + $0x20] sm:$0xf] %vm499_vm7, %v468_v16  ;;  %v205_v16 = vld [vmem:[%s2508_s24 + $0x24] sm:$0xf]  ;;  %v449_v17 = vrot.slane %v447_v7, 5 }
  0x92   : > { %v452_v25 = vpop.permute.xlu0 %451  ;;  %461 = vrot.lane.b32.xlu1 %v330_v11, %s2442_s26  ;;  %v1707_v11 = vsel %vm2510_vm2, %v2274_v58, %v1706_v29  ;;  %222 = vst.msk [vmem:[#allocation2 + $0x18] sm:$0xf] %vm215_vm6, %v205_v16  ;;  %v354_v13 = vsel %vm2532_vm5, %v349_v5, %v353_v6  ;;  %v522_v29 = vld [vmem:[%s2508_s24 + $0x18] sm:$0xe]  ;;  %v539_v58 = vld [vmem:[%s2508_s24 + $0x5c] sm:$0x1] }
  0x93   : > { %500 = vst.msk [vmem:[#allocation2] sm:$0xf] %vm499_vm7, %v452_v25  ;;  %v213_v25 = vld [vmem:[%s2508_s24 + $0x54] sm:$0xf]  ;;  %v450_v30 = vsel %vm2532_vm5, %v445_v19, %v449_v17  ;;  %v2123_v39 = vrot.slane %v522_v29, 9 }
  0x94   : > { %459 = vrot.lane.b32.xlu0 %v320_v20, %s2442_s26  ;;  %v470_v37 = vpop.permute.xlu1 %469  ;;  %672 = vst.msk [vmem:[#allocation2] sm:$0xf] %vm671_vm8, %v624_v62  ;;  %v430_v62 = vrot.slane %v428_v45, 4  ;;  %v583_v20 = vrot.slane %v2880_v9, 5  ;;  %v2136_v16 = vld [vmem:[%s2508_s24 + $0x28] sm:$0xf] }
  0x95   : > { %509 = vst.msk [vmem:[#allocation2 + $0x24] sm:$0xf] %vm499_vm7, %v470_v37  ;;  %v526_v37 = vld [vmem:[%s2508_s24 + $0x28] sm:$0xf] }
  0x96   : > { %v454_v48 = vpop.permute.xlu0 %453  ;;  %477 = vrot.lane.b32.xlu1 %v426_v26, %s2442_s26  ;;  %v434_v14 = vor.u32 %v433_v2, %v430_v62  ;;  %v344_v26 = vsel %vm2532_vm5, %v339_v12, %v2835_v31  ;;  %230 = vst.msk [vmem:[#allocation2 + $0x38] sm:$0xf] %vm215_vm6, %v213_v25  ;;  %v585_v33 = vrot.slane %v583_v20, 4  ;;  %v611_v31 = vrot.slane %v535_v24, 5  ;;  %v537_v62 = vld [vmem:[%s2508_s24 + $0x54] sm:$0xe] }
  0x97   : > { %501 = vst.msk [vmem:[#allocation2 + $0x4] sm:$0xf] %vm499_vm7, %v454_v48  ;;  %v590_v45 = vrot.slane %v526_v37, 5  ;;  %v527_v48 = vld [vmem:[%s2508_s24 + $0x2c] sm:$0x1]  ;;  %v584_v49 = vsel %vm2510_vm2, %v2123_v39, %v583_v20  ;;  %v2128_v6 = vrot.slane %v537_v62, 9 }
  0x98   : > { %475 = vrot.lane.b32.xlu0 %v416_v38, %s2442_s26  ;;  %v458_v56 = vpop.permute.xlu1 %457  ;;  %673 = vst.msk [vmem:[#allocation2 + $0x4] sm:$0xf] %vm671_vm8, %v2795_v59  ;;  %v1900_v59 = vsel %vm1898_vm9, %v2391_v55, 0  ;;  %v435_v27 = vrot.slane %v434_v14, 4  ;;  %v587_v42 = vsel %vm2510_vm2, %v585_v33, %v586_v34  ;;  %v613_v43 = vrot.slane %v611_v31, 4 }
  0x99   : > { %503 = vst.msk [vmem:[#allocation2 + $0xc] sm:$0xf] %vm499_vm7, %v458_v56  ;;  %2312 = vmatpush3.bf16.msra.mxu0 %v1900_v59  ;;  %2336 = vmatpush3.bf16.msra.mxu1 %v1900_v59  ;;  %v592_v54 = vrot.slane %v590_v45, 4  ;;  %v593_v55 = vrot.slane %v527_v48, 5  ;;  %v612_v60 = vsel %vm2510_vm2, %v2127_v50, %v611_v31  ;;  %v2135_v20 = vld [vmem:[%s2508_s24 + $0x24] sm:$0xf] }
  0x9a   : > { %v456_v1 = vpop.permute.xlu0 %455  ;;  %1731 = vrot.lane.b32.xlu1 %v1682_v46, %s2448_s5  ;;  %2313 = vmatprep.subr.bf16.mxu0 %v2393_v61  ;;  %v440_v38 = vsel %vm2532_vm5, %v435_v27, %v2856_v53  ;;  %v538_v46 = vld [vmem:[%s2508_s24 + $0x58] sm:$0xf]  ;;  %v615_v53 = vsel %vm2510_vm2, %v613_v43, %v614_v44  ;;  %v958_v34 = vshrl.u32 %v2165_v21, 16  ;;  %v961_v31 = vshll.u32 %v2165_v21, 16  ;;  %v2138_v43 = vld [vmem:[%s2508_s24 + $0x34] sm:$0xf] }
  0x9b   : > { %502 = vst.msk [vmem:[#allocation2 + $0x8] sm:$0xf] %vm499_vm7, %v456_v1  ;;  %2334 = vmatprep.subr.bf16.mxu1 %v2393_v61  ;;  %v618_v56 = vrot.slane %v538_v46, 5  ;;  %v594_v2 = vsel %vm2510_vm2, %v592_v54, %v593_v55  ;;  %v2144_v27 = vld [vmem:[%s2508_s24 + $0x58] sm:$0xf] }
  0x9c   : > { %1729 = vrot.lane.b32.xlu0 %v1679_v57, %s2448_s5  ;;  %v474_v8 = vpop.permute.xlu1 %473  ;;  %v2167_v44 = vld [vmem:[%s2508_s24 + $0x5c] sm:$0x1]  ;;  %v963_v50 = vrot.slane %v961_v31, 5  ;;  %v2158_v62 = vld [vmem:[%s2508_s24 + $0x38] sm:$0x1] }
  0x9d   : > { %511 = vst.msk [vmem:[#allocation2 + $0x2c] sm:$0xf] %vm499_vm7, %v474_v8  ;;  %2314 = vmatpush3.bf16.msra.mxu0 %v2393_v61  ;;  %2337 = vmatpush3.bf16.msra.mxu1 %v2393_v61  ;;  %v2124_v61 = vrot.slane %v525_v52, 9  ;;  %v620_v1 = vrot.slane %v618_v56, 4  ;;  %v2154_v8 = vld [vmem:[%s2508_s24 + $0x28] sm:$0xf] }
  0x9e   : > { %v472_v18 = vpop.permute.xlu0 %471  ;;  %1747 = vrot.lane.b32.xlu1 %v1710_v4, %s2448_s5  ;;  %2315 = vmatprep.subr.bf16.mxu0 %v2394_v10  ;;  %v621_v4 = vrot.slane %v539_v58, 5  ;;  %v871_v14 = vshll.u32 %v2154_v8, 16  ;;  %v875_v15 = vshrl.u32 %v2154_v8, 16  ;;  %v2137_v52 = vld [vmem:[%s2508_s24 + $0x30] sm:$0xf] }
  0x9f   : > { %510 = vst.msk [vmem:[#allocation2 + $0x28] sm:$0xf] %vm499_vm7, %v472_v18  ;;  %2335 = vmatprep.subr.bf16.mxu1 %v2394_v10  ;;  %v591_v5 = vsel %vm2510_vm2, %v2124_v61, %v590_v45  ;;  %v2166_v18 = vld [vmem:[%s2508_s24 + $0x58] sm:$0xf]  ;;  %v977_v61 = vshll.u32 %v2167_v44, 16 }
  0xa0   : > { %1745 = vrot.lane.b32.xlu0 %v1707_v11, %s2448_s5  ;;  %v642_v22 = vpop.permute.xlu1 %641  ;;  %v622_v7 = vsel %vm2510_vm2, %v620_v1, %v621_v4  ;;  %v2153_v11 = vld [vmem:[%s2508_s24 + $0x24] sm:$0xf]  ;;  %v2971_v23 = vrot.slane %v871_v14, 5  ;;  %v877_v24 = vrot.slane %v875_v15, 4  ;;  %v967_v25 = vshll.u32 %v2166_v18, 16 }
  0xa1   : > { %681 = vst.msk [vmem:[#allocation2 + $0x24] sm:$0xf] %vm671_vm8, %v642_v22  ;;  %2316 = vmatpush3.bf16.msra.mxu0 %v2394_v10  ;;  %2338 = vmatpush3.bf16.msra.mxu1 %v2394_v10  ;;  %v619_v10 = vsel %vm2510_vm2, %v2128_v6, %v618_v56  ;;  %v862_v19 = vshrl.u32 %v2153_v11, 16  ;;  %v865_v17 = vshll.u32 %v2153_v11, 16  ;;  %v979_v15 = vrot.slane %v977_v61, 5 }
  0xa2   : > { %v640_v28 = vpop.permute.xlu0 %639  ;;  %465 = vrot.lane.b32.xlu1 %v354_v13, %s2442_s26 }
  0xa3   : > { %680 = vst.msk [vmem:[#allocation2 + $0x20] sm:$0xf] %vm671_vm8, %v640_v28  ;;  %v2155_v28 = vld [vmem:[%s2508_s24 + $0x2c] sm:$0x1]  ;;  %v867_v33 = vrot.slane %v865_v17, 5 }
  0xa4   : > { %463 = vrot.lane.b32.xlu0 %v344_v26, %s2442_s26  ;;  %v630_v35 = vpop.permute.xlu1 %629  ;;  %v971_v26 = vshrl.u32 %v2166_v18, 16  ;;  %v881_v39 = vshll.u32 %v2155_v28, 16 }
  0xa5   : > { %675 = vst.msk [vmem:[#allocation2 + $0xc] sm:$0xf] %vm671_vm8, %v630_v35  ;;  %v2157_v35 = vld [vmem:[%s2508_s24 + $0x34] sm:$0xf] }
  0xa6   : > { %v628_v40 = vpop.permute.xlu0 %627  ;;  %481 = vrot.lane.b32.xlu1 %v450_v30, %s2442_s26  ;;  %v864_v30 = vrot.slane %v862_v19, 4  ;;  %v973_v41 = vrot.slane %v971_v26, 4  ;;  %v895_v45 = vshll.u32 %v2157_v35, 16  ;;  %v883_v58 = vrot.slane %v881_v39, 5 }
  0xa7   : > { %674 = vst.msk [vmem:[#allocation2 + $0x8] sm:$0xf] %vm671_vm8, %v628_v40  ;;  %v2982_v40 = vrot.slane %v967_v25, 5 }
  0xa8   : > { %479 = vrot.lane.b32.xlu0 %v440_v38, %s2442_s26  ;;  %v646_v47 = vpop.permute.xlu1 %645  ;;  %v878_v38 = vor.u32 %v877_v24, %v2971_v23  ;;  %v868_v46 = vor.u32 %v867_v33, %v864_v30 }
  0xa9   : > { %683 = vst.msk [vmem:[#allocation2 + $0x2c] sm:$0xf] %vm671_vm8, %v646_v47  ;;  %v899_v47 = vshrl.u32 %v2157_v35, 16  ;;  %v2178_v35 = vld [vmem:[%s2508_s24 + $0x28] sm:$0xf] }
  0xaa   : > { %v644_v51 = vpop.permute.xlu0 %643  ;;  %633 = vrot.lane.b32.xlu1 %v587_v42, %s2441_s25  ;;  %v2156_v42 = vld [vmem:[%s2508_s24 + $0x30] sm:$0xf]  ;;  %v869_v6 = vrot.slane %v868_v46, 4  ;;  %v1134_v44 = vrot.slane %v2178_v35, 5 }
  0xab   : > { %682 = vst.msk [vmem:[#allocation2 + $0x28] sm:$0xf] %vm671_vm8, %v644_v51  ;;  %v2169_v51 = vld [vmem:[%s2508_s24 + $0x64] sm:$0xf]  ;;  %v886_v54 = vshrl.u32 %v2156_v42, 16  ;;  %v889_v55 = vshll.u32 %v2156_v42, 16 }
  0xac   : > { %631 = vrot.lane.b32.xlu0 %v584_v49, %s2441_s25  ;;  %v727_v57 = vpop.permute.xlu1 %726  ;;  %v960_v49 = vrot.slane %v958_v34, 4  ;;  %v901_v1 = vrot.slane %v899_v47, 4  ;;  %v991_v4 = vshll.u32 %v2169_v51, 16  ;;  %v874_v21 = vsel %vm2532_vm5, %v869_v6, %v2971_v23  ;;  %v2179_v47 = vld [vmem:[%s2508_s24 + $0x2c] sm:$0x1] }
  0xad   : > { %774 = vst.msk [vmem:[#allocation2 + $0x4] sm:$0xf] %vm772_vm10, %v727_v57  ;;  %v879_v57 = vrot.slane %v878_v38, 4  ;;  %v888_v8 = vrot.slane %v886_v54, 4  ;;  %v2193_v6 = vld [vmem:[%s2508_s24 + $0x64] sm:$0xf] }
  0xae   : > { %v725_v63 = vpop.permute.xlu0 %724  ;;  %649 = vrot.lane.b32.xlu1 %v615_v53, %s2441_s25  ;;  %v2146_v53 = vld [vmem:[%s2508_s24 + $0x64] sm:$0xf]  ;;  %v3008_v19 = vrot.slane %v991_v4, 5 }
  0xaf   : > { %773 = vst.msk [vmem:[#allocation2] sm:$0xf] %vm772_vm10, %v725_v63  ;;  %v2168_v63 = vld [vmem:[%s2508_s24 + $0x60] sm:$0xf]  ;;  %v884_v14 = vsel %vm2532_vm5, %v879_v57, %v883_v58  ;;  %v2181_v57 = vld [vmem:[%s2508_s24 + $0x34] sm:$0xf] }
  0xb0   : > { %647 = vrot.lane.b32.xlu0 %v612_v60, %s2441_s25  ;;  %v743_v59 = vpop.permute.xlu1 %742  ;;  %v974_v60 = vor.u32 %v973_v41, %v2982_v40  ;;  %v985_v11 = vshll.u32 %v2168_v63, 16  ;;  %v1141_v4 = vrot.slane %v2181_v57, 5 }
  0xb1   : > { %782 = vst.msk [vmem:[#allocation2 + $0x24] sm:$0xf] %vm772_vm10, %v743_v59  ;;  %v995_v59 = vshrl.u32 %v2169_v51, 16 }
  0xb2   : > { %v741_v3 = vpop.permute.xlu0 %740  ;;  %637 = vrot.lane.b32.xlu1 %v594_v2, %s2441_s25  ;;  %v2998_v2 = vrot.slane %v895_v45, 5  ;;  %v975_v18 = vrot.slane %v974_v60, 4 }
  0xb3   : > { %781 = vst.msk [vmem:[#allocation2 + $0x20] sm:$0xf] %vm772_vm10, %v741_v3  ;;  %v964_v3 = vor.u32 %v963_v50, %v960_v49  ;;  %v997_v17 = vrot.slane %v995_v59, 4  ;;  %v2177_v50 = vld [vmem:[%s2508_s24 + $0x24] sm:$0xe] }
  0xb4   : > { %635 = vrot.lane.b32.xlu0 %v591_v5, %s2441_s25  ;;  %v731_v9 = vpop.permute.xlu1 %730  ;;  %v980_v30 = vsel %vm2532_vm5, %v975_v18, %v979_v15  ;;  %v2197_v60 = vrot.slane %v2177_v50, 9 }
  0xb5   : > { %776 = vst.msk [vmem:[#allocation2 + $0xc] sm:$0xf] %vm772_vm10, %v731_v9  ;;  %v891_v9 = vrot.slane %v889_v55, 5  ;;  %v965_v24 = vrot.slane %v964_v3, 4  ;;  %v998_v23 = vor.u32 %v997_v17, %v3008_v19  ;;  %v2192_v17 = vld [vmem:[%s2508_s24 + $0x60] sm:$0xe] }
  0xb6   : > { %v729_v12 = vpop.permute.xlu0 %728  ;;  %653 = vrot.lane.b32.xlu1 %v622_v7, %s2441_s25  ;;  %v2145_v7 = vld [vmem:[%s2508_s24 + $0x60] sm:$0xf]  ;;  %v1135_v3 = vsel %vm2510_vm2, %v2197_v60, %v1134_v44 }
  0xb7   : > { %775 = vst.msk [vmem:[#allocation2 + $0x8] sm:$0xf] %vm772_vm10, %v729_v12  ;;  %v892_v25 = vor.u32 %v891_v9, %v888_v8  ;;  %v999_v42 = vrot.slane %v998_v23, 4  ;;  %v2180_v9 = vld [vmem:[%s2508_s24 + $0x30] sm:$0xe] }
  0xb8   : > { %651 = vrot.lane.b32.xlu0 %v619_v10, %s2441_s25  ;;  %v747_v13 = vpop.permute.xlu1 %746  ;;  %v982_v10 = vshrl.u32 %v2168_v63, 16  ;;  %v2189_v63 = vld [vmem:[%s2508_s24 + $0x54] sm:$0xe]  ;;  %v2227_v23 = vld [vmem:[%s2508_s24 + $0x30] sm:$0xf] }
  0xb9   : > { %784 = vst.msk [vmem:[#allocation2 + $0x2c] sm:$0xf] %vm772_vm10, %v747_v13  ;;  %v902_v13 = vor.u32 %v901_v1, %v2998_v2 }
  0xba   : > { %v745_v22 = vpop.permute.xlu0 %744  ;;  %734 = vrot.lane.b32.xlu1 %v2136_v16, %s2443_s27  ;;  %v905_v16 = vshll.u32 %v2158_v62, 16  ;;  %v984_v26 = vrot.slane %v982_v10, 4 }
  0xbb   : > { %783 = vst.msk [vmem:[#allocation2 + $0x28] sm:$0xf] %vm772_vm10, %v745_v22  ;;  %v2170_v22 = vld [vmem:[%s2508_s24 + $0x68] sm:$0x1]  ;;  %v903_v33 = vrot.slane %v902_v13, 4  ;;  %v2198_v13 = vrot.slane %v2180_v9, 9 }
  0xbc   : > { %732 = vrot.lane.b32.xlu0 %v2135_v20, %s2443_s27  ;;  %v1008_v29 = vpop.permute.xlu1 %1007  ;;  %v1001_v34 = vshll.u32 %v2170_v22, 16  ;;  %v2211_v9 = vld [vmem:[%s2508_s24 + $0x3c] sm:$0xf] }
  0xbd   : > { %1055 = vst.msk [vmem:[#allocation2 + $0x4] sm:$0xf] %vm1053_vm11, %v1008_v29  ;;  %v907_v29 = vrot.slane %v905_v16, 5  ;;  %v2194_v16 = vld [vmem:[%s2508_s24 + $0x68] sm:$0x1] }
  0xbe   : > { %v1006_v37 = vpop.permute.xlu0 %1005  ;;  %750 = vrot.lane.b32.xlu1 %v2144_v27, %s2443_s27  ;;  %v987_v27 = vrot.slane %v985_v11, 5  ;;  %v1143_v11 = vrot.slane %v1141_v4, 4  ;;  %v1172_v22 = vrot.slane %v2194_v16, 5 }
  0xbf   : > { %1054 = vst.msk [vmem:[#allocation2] sm:$0xf] %vm1053_vm11, %v1006_v37  ;;  %v893_v37 = vrot.slane %v892_v25, 4  ;;  %v908_v41 = vsel %vm2532_vm5, %v903_v33, %v907_v29  ;;  %v1142_v25 = vsel %vm2510_vm2, %v2198_v13, %v1141_v4  ;;  %v2228_v29 = vld [vmem:[%s2508_s24 + $0x34] sm:$0xf] }
  0xc0   : > { %748 = vrot.lane.b32.xlu0 %v2143_v36, %s2443_s27  ;;  %v1024_v48 = vpop.permute.xlu1 %1023  ;;  %v970_v36 = vsel %vm2532_vm5, %v965_v24, %v2982_v40  ;;  %v988_v38 = vor.u32 %v987_v27, %v984_v26  ;;  %v2190_v40 = vld [vmem:[%s2508_s24 + $0x58] sm:$0xf]  ;;  %v2202_v26 = vrot.slane %v2192_v17, 9  ;;  %v1426_v35 = vshrl.u32 %v2228_v29, 16  ;;  %v2232_v17 = vld [vmem:[%s2508_s24 + $0x44] sm:$0x1] }
  0xc1   : > { %1063 = vst.msk [vmem:[#allocation2 + $0x24] sm:$0xf] %vm1053_vm11, %v1024_v48  ;;  %v898_v48 = vsel %vm2532_vm5, %v893_v37, %v2998_v2  ;;  %v1162_v54 = vrot.slane %v2190_v40, 5  ;;  %v2240_v37 = vld [vmem:[%s2508_s24 + $0x64] sm:$0xf] }
  0xc2   : > { %v1022_v56 = vpop.permute.xlu0 %1021  ;;  %738 = vrot.lane.b32.xlu1 %v2138_v43, %s2443_s27  ;;  %v1003_v43 = vrot.slane %v1001_v34, 5  ;;  %v989_v46 = vrot.slane %v988_v38, 4  ;;  %v1518_v40 = vshll.u32 %v2240_v37, 16 }
  0xc3   : > { %1062 = vst.msk [vmem:[#allocation2 + $0x20] sm:$0xf] %vm1053_vm11, %v1022_v56  ;;  %v2191_v56 = vld [vmem:[%s2508_s24 + $0x5c] sm:$0x1]  ;;  %v1164_v2 = vrot.slane %v1162_v54, 4 }
  0xc4   : > { %736 = vrot.lane.b32.xlu0 %v2137_v52, %s2443_s27  ;;  %v1012_v5 = vpop.permute.xlu1 %1011  ;;  %v1004_v51 = vsel %vm2532_vm5, %v999_v42, %v1003_v43  ;;  %v1136_v52 = vrot.slane %v1134_v44, 4  ;;  %v994_v58 = vsel %vm2532_vm5, %v989_v46, %v3008_v19  ;;  %v1165_v1 = vrot.slane %v2191_v56, 5  ;;  %v2209_v42 = vld [vmem:[%s2508_s24 + $0x30] sm:$0xf]  ;;  %v2239_v43 = vld [vmem:[%s2508_s24 + $0x60] sm:$0xf] }
  0xc5   : > { %1057 = vst.msk [vmem:[#allocation2 + $0xc] sm:$0xf] %vm1053_vm11, %v1012_v5  ;;  %v2182_v5 = vld [vmem:[%s2508_s24 + $0x38] sm:$0x1]  ;;  %v2218_v46 = vld [vmem:[%s2508_s24 + $0x64] sm:$0xf] }
  0xc6   : > { %v1010_v12 = vpop.permute.xlu0 %1009  ;;  %754 = vrot.lane.b32.xlu1 %v2146_v53, %s2443_s27  ;;  %v1137_v53 = vrot.slane %v2179_v47, 5  ;;  %v1166_v10 = vsel %vm2510_vm2, %v1164_v2, %v1165_v1  ;;  %v1428_v47 = vrot.slane %v1426_v35, 4  ;;  %v2217_v56 = vld [vmem:[%s2508_s24 + $0x60] sm:$0xf]  ;;  %v2241_v1 = vld [vmem:[%s2508_s24 + $0x68] sm:$0x1] }
  0xc7   : > { %1056 = vst.msk [vmem:[#allocation2 + $0x8] sm:$0xf] %vm1053_vm11, %v1010_v12  ;;  %v1144_v12 = vrot.slane %v2182_v5, 5  ;;  %v2212_v2 = vld [vmem:[%s2508_s24 + $0x40] sm:$0xf]  ;;  %v1528_v13 = vshll.u32 %v2241_v1, 16 }
  0xc8   : > { %752 = vrot.lane.b32.xlu0 %v2145_v7, %s2443_s27  ;;  %v1028_v20 = vpop.permute.xlu1 %1027  ;;  %v1138_v62 = vsel %vm2510_vm2, %v1136_v52, %v1137_v53  ;;  %v2201_v7 = vrot.slane %v2189_v63, 9  ;;  %v1509_v53 = vshrl.u32 %v2239_v43, 16  ;;  %s3293_s27 = scalar_lea.vmem %s3329_s3, %s2117_s22 }
  0xc9   : > { %1065 = vst.msk [vmem:[#allocation2 + $0x2c] sm:$0xf] %vm1053_vm11, %v1028_v20  ;;  %v1145_v20 = vsel %vm2510_vm2, %v1143_v11, %v1144_v12  ;;  %v1530_v35 = vrot.slane %v1528_v13, 5 }
  0xca   : > { %v1026_v28 = vpop.permute.xlu0 %1025  ;;  %1015 = vrot.lane.b32.xlu1 %v884_v14, %s2444_s28  ;;  %v1169_v14 = vrot.slane %v2193_v6, 5  ;;  %v1163_v18 = vsel %vm2510_vm2, %v2201_v7, %v1162_v54  ;;  %v1512_v54 = vshll.u32 %v2239_v43, 16 }
  0xcb   : > { %1064 = vst.msk [vmem:[#allocation2 + $0x28] sm:$0xf] %vm1053_vm11, %v1026_v28 }
  0xcc   : > { %1013 = vrot.lane.b32.xlu0 %v874_v21, %s2444_s28  ;;  %v1177_v31 = vpop.permute.xlu1 %1176  ;;  %v1171_v21 = vrot.slane %v1169_v14, 4  ;;  %v1170_v33 = vsel %vm2510_vm2, %v2202_v26, %v1169_v14  ;;  %v1514_v7 = vrot.slane %v1512_v54, 5 }
  0xcd   : > { %1224 = vst.msk [vmem:[#allocation2 + $0x4] sm:$0xf] %vm1222_vm12, %v1177_v31  ;;  %v1422_v31 = vshll.u32 %v2228_v29, 16 }
  0xce   : > { %v1175_v39 = vpop.permute.xlu0 %1174  ;;  %1031 = vrot.lane.b32.xlu1 %v980_v30, %s2444_s28  ;;  %v1173_v28 = vsel %vm2510_vm2, %v1171_v21, %v1172_v22 }
  0xcf   : > { %1223 = vst.msk [vmem:[#allocation2] sm:$0xf] %vm1222_vm12, %v1175_v39  ;;  %v1413_v39 = vshrl.u32 %v2227_v23, 16 }
  0xd0   : > { %1029 = vrot.lane.b32.xlu0 %v970_v36, %s2444_s28  ;;  %v1193_v45 = vpop.permute.xlu1 %1192  ;;  %v2210_v36 = vld [vmem:[%s2508_s24 + $0x34] sm:$0xf] }
  0xd1   : > { %1232 = vst.msk [vmem:[#allocation2 + $0x24] sm:$0xf] %vm1222_vm12, %v1193_v45  ;;  %v3099_v45 = vrot.slane %v1422_v31, 5 }
  0xd2   : > { %v1191_v49 = vpop.permute.xlu0 %1190  ;;  %1019 = vrot.lane.b32.xlu1 %v908_v41, %s2444_s28  ;;  %v1416_v41 = vshll.u32 %v2227_v23, 16 }
  0xd3   : > { %1231 = vst.msk [vmem:[#allocation2 + $0x20] sm:$0xf] %vm1222_vm12, %v1191_v49  ;;  %v2229_v49 = vld [vmem:[%s2508_s24 + $0x38] sm:$0x1] }
  0xd4   : > { %1017 = vrot.lane.b32.xlu0 %v898_v48, %s2444_s28  ;;  %v1181_v55 = vpop.permute.xlu1 %1180  ;;  %v1522_v48 = vshrl.u32 %v2240_v37, 16  ;;  %v1418_v52 = vrot.slane %v1416_v41, 5  ;;  %v1432_v60 = vshll.u32 %v2229_v49, 16 }
  0xd5   : > { %1226 = vst.msk [vmem:[#allocation2 + $0xc] sm:$0xf] %vm1222_vm12, %v1181_v55  ;;  %v2231_v55 = vld [vmem:[%s2508_s24 + $0x40] sm:$0xf] }
  0xd6   : > { %v1179_v61 = vpop.permute.xlu0 %1178  ;;  %1035 = vrot.lane.b32.xlu1 %v1004_v51, %s2444_s28  ;;  %v1415_v51 = vrot.slane %v1413_v39, 4  ;;  %v1524_v63 = vrot.slane %v1522_v48, 4  ;;  %v1446_v4 = vshll.u32 %v2231_v55, 16  ;;  %v1434_v16 = vrot.slane %v1432_v60, 5 }
  0xd7   : > { %1225 = vst.msk [vmem:[#allocation2 + $0x8] sm:$0xf] %vm1222_vm12, %v1179_v61  ;;  %v3110_v61 = vrot.slane %v1518_v40, 5 }
  0xd8   : > { %1033 = vrot.lane.b32.xlu0 %v994_v58, %s2444_s28  ;;  %v1197_v59 = vpop.permute.xlu1 %1196  ;;  %v1429_v58 = vor.u32 %v1428_v47, %v3099_v45  ;;  %v1419_v6 = vor.u32 %v1418_v52, %v1415_v51 }
  0xd9   : > { %1234 = vst.msk [vmem:[#allocation2 + $0x2c] sm:$0xf] %vm1222_vm12, %v1197_v59  ;;  %v1450_v59 = vshrl.u32 %v2231_v55, 16  ;;  %v2252_v55 = vld [vmem:[%s2508_s24 + $0x34] sm:$0xf] }
  0xda   : > { %v1195_v8 = vpop.permute.xlu0 %1194  ;;  %1184 = vrot.lane.b32.xlu1 %v1138_v62, %s2445_s29  ;;  %v2230_v62 = vld [vmem:[%s2508_s24 + $0x3c] sm:$0xf]  ;;  %v1420_v26 = vrot.slane %v1419_v6, 4  ;;  %v1685_v1 = vrot.slane %v2252_v55, 5 }
  0xdb   : > { %1233 = vst.msk [vmem:[#allocation2 + $0x28] sm:$0xf] %vm1222_vm12, %v1195_v8  ;;  %v2243_v8 = vld [vmem:[%s2508_s24 + $0x70] sm:$0xf]  ;;  %v1437_v11 = vshrl.u32 %v2230_v62, 16  ;;  %v1440_v12 = vshll.u32 %v2230_v62, 16 }
  0xdc   : > { %1182 = vrot.lane.b32.xlu0 %v1135_v3, %s2445_s29  ;;  %v1278_v15 = vpop.permute.xlu1 %1277  ;;  %v1511_v3 = vrot.slane %v1509_v53, 4  ;;  %v1452_v21 = vrot.slane %v1450_v59, 4  ;;  %v1542_v22 = vshll.u32 %v2243_v8, 16  ;;  %v1425_v43 = vsel %vm2532_vm5, %v1420_v26, %v3099_v45  ;;  %v2253_v59 = vld [vmem:[%s2508_s24 + $0x38] sm:$0x1] }
  0xdd   : > { %1325 = vst.msk [vmem:[#allocation2 + $0x4] sm:$0xf] %vm1323_vm13, %v1278_v15  ;;  %v1430_v15 = vrot.slane %v1429_v58, 4  ;;  %v1439_v29 = vrot.slane %v1437_v11, 4  ;;  %v2267_v26 = vld [vmem:[%s2508_s24 + $0x70] sm:$0xf] }
  0xde   : > { %v1276_v19 = vpop.permute.xlu0 %1275  ;;  %1200 = vrot.lane.b32.xlu1 %v1166_v10, %s2445_s29  ;;  %v2220_v10 = vld [vmem:[%s2508_s24 + $0x70] sm:$0xf]  ;;  %v3136_v39 = vrot.slane %v1542_v22, 5 }
  0xdf   : > { %1324 = vst.msk [vmem:[#allocation2] sm:$0xf] %vm1323_vm13, %v1276_v19  ;;  %v2242_v19 = vld [vmem:[%s2508_s24 + $0x6c] sm:$0xf]  ;;  %v1435_v31 = vsel %vm2532_vm5, %v1430_v15, %v1434_v16  ;;  %v2255_v15 = vld [vmem:[%s2508_s24 + $0x40] sm:$0xf] }
  0xe0   : > { %1198 = vrot.lane.b32.xlu0 %v1163_v18, %s2445_s29  ;;  %v1294_v24 = vpop.permute.xlu1 %1293  ;;  %v1525_v18 = vor.u32 %v1524_v63, %v3110_v61  ;;  %v1536_v23 = vshll.u32 %v2242_v19, 16 }
  0xe1   : > { %1333 = vst.msk [vmem:[#allocation2 + $0x24] sm:$0xf] %vm1323_vm13, %v1294_v24  ;;  %v1546_v24 = vshrl.u32 %v2243_v8, 16 }
  0xe2   : > { %v1292_v27 = vpop.permute.xlu0 %1291  ;;  %1188 = vrot.lane.b32.xlu1 %v1145_v20, %s2445_s29  ;;  %v3126_v20 = vrot.slane %v1446_v4, 5  ;;  %v1526_v37 = vrot.slane %v1525_v18, 4 }
  0xe3   : > { %1332 = vst.msk [vmem:[#allocation2 + $0x20] sm:$0xf] %vm1323_vm13, %v1292_v27  ;;  %v1515_v27 = vor.u32 %v1514_v7, %v1511_v3  ;;  %v1548_v41 = vrot.slane %v1546_v24, 4  ;;  %v2251_v7 = vld [vmem:[%s2508_s24 + $0x30] sm:$0xe]  ;;  %v1692_v24 = vrot.slane %v2255_v15, 5 }
  0xe4   : > { %1186 = vrot.lane.b32.xlu0 %v1142_v25, %s2445_s29  ;;  %v1282_v30 = vpop.permute.xlu1 %1281  ;;  %v1531_v51 = vsel %vm2532_vm5, %v1526_v37, %v1530_v35  ;;  %v2271_v18 = vrot.slane %v2251_v7, 9  ;;  %v1720_v35 = vrot.slane %v2267_v26, 5  ;;  %v2268_v37 = vld [vmem:[%s2508_s24 + $0x74] sm:$0x1] }
  0xe5   : > { %1327 = vst.msk [vmem:[#allocation2 + $0xc] sm:$0xf] %vm1323_vm13, %v1282_v30  ;;  %v1442_v30 = vrot.slane %v1440_v12, 5  ;;  %v1516_v47 = vrot.slane %v1515_v27, 4  ;;  %v1549_v45 = vor.u32 %v1548_v41, %v3136_v39 }
  0xe6   : > { %v1280_v34 = vpop.permute.xlu0 %1279  ;;  %1204 = vrot.lane.b32.xlu1 %v1173_v28, %s2445_s29  ;;  %v2219_v28 = vld [vmem:[%s2508_s24 + $0x6c] sm:$0xf]  ;;  %v1686_v27 = vsel %vm2510_vm2, %v2271_v18, %v1685_v1 }
  0xe7   : > { %1326 = vst.msk [vmem:[#allocation2 + $0x8] sm:$0xf] %vm1323_vm13, %v1280_v34  ;;  %v1443_v40 = vor.u32 %v1442_v30, %v1439_v29  ;;  %v1550_v62 = vrot.slane %v1549_v45, 4 }
  0xe8   : > { %1202 = vrot.lane.b32.xlu0 %v1170_v33, %s2445_s29  ;;  %v1298_v38 = vpop.permute.xlu1 %1297  ;;  %v1533_v33 = vshrl.u32 %v2242_v19, 16 }
  0xe9   : > { %1335 = vst.msk [vmem:[#allocation2 + $0x2c] sm:$0xf] %vm1323_vm13, %v1298_v38  ;;  %v1453_v38 = vor.u32 %v1452_v21, %v3126_v20 }
  0xea   : > { %v1296_v44 = vpop.permute.xlu0 %1295  ;;  %1285 = vrot.lane.b32.xlu1 %v2210_v36, %s2446_s30  ;;  %v1456_v36 = vshll.u32 %v2232_v17, 16  ;;  %v1535_v48 = vrot.slane %v1533_v33, 4  ;;  %v2263_v17 = vld [vmem:[%s2508_s24 + $0x60] sm:$0xe]  ;;  %v2254_v33 = vld [vmem:[%s2508_s24 + $0x3c] sm:$0xe] }
  0xeb   : > { %1334 = vst.msk [vmem:[#allocation2 + $0x28] sm:$0xf] %vm1323_vm13, %v1296_v44  ;;  %v2244_v44 = vld [vmem:[%s2508_s24 + $0x74] sm:$0x1]  ;;  %v1454_v52 = vrot.slane %v1453_v38, 4 }
  0xec   : > { %1283 = vrot.lane.b32.xlu0 %v2209_v42, %s2446_s30  ;;  %v1559_v50 = vpop.permute.xlu1 %1558  ;;  %v1552_v53 = vshll.u32 %v2244_v44, 16  ;;  %v1722_v44 = vrot.slane %v1720_v35, 4 }
  0xed   : > { %1606 = vst.msk [vmem:[#allocation2 + $0x4] sm:$0xf] %vm1604_vm14, %v1559_v50  ;;  %v1458_v50 = vrot.slane %v1456_v36, 5 }
  0xee   : > { %v1557_v57 = vpop.permute.xlu0 %1556  ;;  %1301 = vrot.lane.b32.xlu1 %v2218_v46, %s2446_s30  ;;  %v1538_v46 = vrot.slane %v1536_v23, 5 }
  0xef   : > { %1605 = vst.msk [vmem:[#allocation2] sm:$0xf] %vm1604_vm14, %v1557_v57  ;;  %v1444_v57 = vrot.slane %v1443_v40, 4  ;;  %v1459_v63 = vsel %vm2532_vm5, %v1454_v52, %v1458_v50 }
  0xf0   : > { %1299 = vrot.lane.b32.xlu0 %v2217_v56, %s2446_s30  ;;  %v1575_v5 = vpop.permute.xlu1 %1574  ;;  %v1521_v56 = vsel %vm2532_vm5, %v1516_v47, %v3110_v61  ;;  %v1539_v58 = vor.u32 %v1538_v46, %v1535_v48  ;;  %v2264_v61 = vld [vmem:[%s2508_s24 + $0x64] sm:$0xf]  ;;  %v1723_v47 = vrot.slane %v2268_v37, 5 }
  0xf1   : > { %1614 = vst.msk [vmem:[#allocation2 + $0x24] sm:$0xf] %vm1604_vm14, %v1575_v5  ;;  %v1449_v5 = vsel %vm2532_vm5, %v1444_v57, %v3126_v20  ;;  %v1713_v11 = vrot.slane %v2264_v61, 5 }
  0xf2   : > { %v1573_v14 = vpop.permute.xlu0 %1572  ;;  %1289 = vrot.lane.b32.xlu1 %v2212_v2, %s2446_s30  ;;  %v1554_v2 = vrot.slane %v1552_v53, 5  ;;  %v1540_v6 = vrot.slane %v1539_v58, 4  ;;  %v1724_v50 = vsel %vm2510_vm2, %v1722_v44, %v1723_v47 }
  0xf3   : > { %1613 = vst.msk [vmem:[#allocation2 + $0x20] sm:$0xf] %vm1604_vm14, %v1573_v14  ;;  %v2265_v14 = vld [vmem:[%s2508_s24 + $0x68] sm:$0x1]  ;;  %v1715_v21 = vrot.slane %v1713_v11, 4 }
  0xf4   : > { %1287 = vrot.lane.b32.xlu0 %v2211_v9, %s2446_s30  ;;  %v1563_v25 = vpop.permute.xlu1 %1562  ;;  %v1555_v8 = vsel %vm2532_vm5, %v1550_v62, %v1554_v2  ;;  %v1687_v9 = vrot.slane %v1685_v1, 4  ;;  %v1545_v16 = vsel %vm2532_vm5, %v1540_v6, %v3136_v39  ;;  %v1716_v22 = vrot.slane %v2265_v14, 5 }
  0xf5   : > { %1608 = vst.msk [vmem:[#allocation2 + $0xc] sm:$0xf] %vm1604_vm14, %v1563_v25  ;;  %v2256_v25 = vld [vmem:[%s2508_s24 + $0x44] sm:$0x1]  ;;  %v2272_v39 = vrot.slane %v2254_v33, 9 }
  0xf6   : > { %v1561_v34 = vpop.permute.xlu0 %1560  ;;  %1305 = vrot.lane.b32.xlu1 %v2220_v10, %s2446_s30  ;;  %v1688_v10 = vrot.slane %v2253_v59, 5  ;;  %v1717_v23 = vsel %vm2510_vm2, %v1715_v21, %v1716_v22 }
  0xf7   : > { %1607 = vst.msk [vmem:[#allocation2 + $0x8] sm:$0xf] %vm1604_vm14, %v1561_v34  ;;  %v1694_v34 = vrot.slane %v1692_v24, 4  ;;  %v1693_v48 = vsel %vm2510_vm2, %v2272_v39, %v1692_v24 }
  0xf8   : > { %1303 = vrot.lane.b32.xlu0 %v2219_v28, %s2446_s30  ;;  %v1579_v42 = vpop.permute.xlu1 %1578  ;;  %v1689_v20 = vsel %vm2510_vm2, %v1687_v9, %v1688_v10  ;;  %v2275_v28 = vrot.slane %v2263_v17, 9 }
  0xf9   : > { %1616 = vst.msk [vmem:[#allocation2 + $0x2c] sm:$0xf] %vm1604_vm14, %v1579_v42  ;;  %v2266_v42 = vld [vmem:[%s2508_s24 + $0x6c] sm:$0xe] }
  0xfa   : > { %v1577_v49 = vpop.permute.xlu0 %1576  ;;  %1566 = vrot.lane.b32.xlu1 %v1435_v31, %s2447_s4  ;;  %v1695_v31 = vrot.slane %v2256_v25, 5  ;;  %v1714_v38 = vsel %vm2510_vm2, %v2275_v28, %v1713_v11  ;;  %v2276_v46 = vrot.slane %v2266_v42, 9 }
  0xfb   : > { %1615 = vst.msk [vmem:[#allocation2 + $0x28] sm:$0xf] %vm1604_vm14, %v1577_v49 }
  0xfc   : > { %1564 = vrot.lane.b32.xlu0 %v1425_v43, %s2447_s4  ;;  %v1728_v54 = vpop.permute.xlu1 %1727  ;;  %v1696_v43 = vsel %vm2510_vm2, %v1694_v34, %v1695_v31  ;;  %v1721_v52 = vsel %vm2510_vm2, %v2276_v46, %v1720_v35 }
  0xfd   : > { %1775 = vst.msk [vmem:[#allocation2 + $0x4] sm:$0xf] %vm1773_vm15, %v1728_v54 }
  0xfe   : > { %v1726_v60 = vpop.permute.xlu0 %1725  ;;  %1582 = vrot.lane.b32.xlu1 %v1531_v51, %s2447_s4 }
  0xff   : > { %1774 = vst.msk [vmem:[#allocation2] sm:$0xf] %vm1773_vm15, %v1726_v60 }
 0x100   : > { %1580 = vrot.lane.b32.xlu0 %v1521_v56, %s2447_s4  ;;  %v1744_v4 = vpop.permute.xlu1 %1743 }
 0x101   : > { %1783 = vst.msk [vmem:[#allocation2 + $0x24] sm:$0xf] %vm1773_vm15, %v1744_v4 }
 0x102   : > { %v1742_v3 = vpop.permute.xlu0 %1741  ;;  %1570 = vrot.lane.b32.xlu1 %v1459_v63, %s2447_s4 }
 0x103   : > { %1782 = vst.msk [vmem:[#allocation2 + $0x20] sm:$0xf] %vm1773_vm15, %v1742_v3 }
 0x104   : > { %1568 = vrot.lane.b32.xlu0 %v1449_v5, %s2447_s4  ;;  %v462_v12 = vpop.permute.xlu1 %461 }
 0x105   : > { %505 = vst.msk [vmem:[#allocation2 + $0x14] sm:$0xf] %vm499_vm7, %v462_v12 }
 0x106   : > { %v460_v13 = vpop.permute.xlu0 %459  ;;  %1586 = vrot.lane.b32.xlu1 %v1555_v8, %s2447_s4  ;;  %v2390_v19 = vld [vmem:[#allocation2] sm:$0xff]  }
 0x107   : > { %504 = vst.msk [vmem:[#allocation2 + $0x10] sm:$0xf] %vm499_vm7, %v460_v13  ;;  %2317 = vmatprep.mubr.msk.bf16.mxu0 %vm1873_vm0, %v2390_v19 }
 0x108   : > { %1584 = vrot.lane.b32.xlu0 %v1545_v16, %s2447_s4  ;;  %v478_v32 = vpop.permute.xlu1 %477 }
 0x109   : > { %513 = vst.msk [vmem:[#allocation2 + $0x34] sm:$0xf] %vm499_vm7, %v478_v32 }
 0x10a   : > { %v476_v29 = vpop.permute.xlu0 %475  ;;  %1735 = vrot.lane.b32.xlu1 %v1689_v20, %s2448_s5  ;;  %v2392_v30 = vld [vmem:[#allocation2 + $0x20] sm:$0xff]  }
 0x10b   : > { %512 = vst.msk [vmem:[#allocation2 + $0x30] sm:$0xf] %vm499_vm7, %v476_v29  ;;  %2325 = vmatprep.mubr.msk.bf16.mxu1 %vm1873_vm0, %v2392_v30 }
 0x10c   : > { %1733 = vrot.lane.b32.xlu0 %v1686_v27, %s2448_s5  ;;  %v1732_v36 = vpop.permute.xlu1 %1731 }
 0x10d   : > { %1777 = vst.msk [vmem:[#allocation2 + $0xc] sm:$0xf] %vm1773_vm15, %v1732_v36 }
 0x10e   : > { %v1730_v41 = vpop.permute.xlu0 %1729  ;;  %1751 = vrot.lane.b32.xlu1 %v1717_v23, %s2448_s5 }
 0x10f   : > { %1776 = vst.msk [vmem:[#allocation2 + $0x8] sm:$0xf] %vm1773_vm15, %v1730_v41 }
 0x110   : > { %1749 = vrot.lane.b32.xlu0 %v1714_v38, %s2448_s5  ;;  %v1748_v40 = vpop.permute.xlu1 %1747 }
 0x111   : > { %1785 = vst.msk [vmem:[#allocation2 + $0x2c] sm:$0xf] %vm1773_vm15, %v1748_v40 }
 0x112   : > { %v1746_v49 = vpop.permute.xlu0 %1745  ;;  %1739 = vrot.lane.b32.xlu1 %v1696_v43, %s2448_s5 }
 0x113   : > { %1784 = vst.msk [vmem:[#allocation2 + $0x28] sm:$0xf] %vm1773_vm15, %v1746_v49 }
 0x114   : > { %1737 = vrot.lane.b32.xlu0 %v1693_v48, %s2448_s5  ;;  %v466_v51 = vpop.permute.xlu1 %465 }
 0x115   : > { %507 = vst.msk [vmem:[#allocation2 + $0x1c] sm:$0xf] %vm499_vm7, %v466_v51 }
 0x116   : > { %v464_v45 = vpop.permute.xlu0 %463  ;;  %1755 = vrot.lane.b32.xlu1 %v1724_v50, %s2448_s5  ;;  %v2395_v53 = vld [vmem:[#allocation2 + $0x8] sm:$0xff]  }
 0x117   : > { %506 = vst.msk [vmem:[#allocation2 + $0x18] sm:$0xf] %vm499_vm7, %v464_v45  ;;  %2318 = vmatmul.mubr.msk.bf16.vlgmr.msra.gmra.mxu0 %vm1873_vm0, %v2395_v53  ;;  %v2277_v53 = vld [vmem:[%s3328_s2] ss:$0 sm:$0xff] }
 0x118   : > { %1753 = vrot.lane.b32.xlu0 %v1721_v52, %s2448_s5  ;;  %v482_v54 = vpop.permute.xlu1 %481 }
 0x119   : > { %515 = vst.msk [vmem:[#allocation2 + $0x3c] sm:$0xf] %vm499_vm7, %v482_v54 }
 0x11a   : > { %v480_v55 = vpop.permute.xlu0 %479  ;;  %v2396_v56 = vld [vmem:[#allocation2 + $0x28] sm:$0xff]  }
 0x11b   : > { %514 = vst.msk [vmem:[#allocation2 + $0x38] sm:$0xf] %vm499_vm7, %v480_v55  ;;  %2326 = vmatmul.mubr.msk.bf16.vlgmr.msra.gmra.mxu1 %vm1873_vm0, %v2396_v56 }
 0x11c   : > { %v634_v0 = vpop.permute.xlu1 %633 }
 0x11d   : > { %677 = vst.msk [vmem:[#allocation2 + $0x14] sm:$0xf] %vm671_vm8, %v634_v0 }
 0x11e   : > { %v632_v57 = vpop.permute.xlu0 %631 }
 0x11f   : > { %676 = vst.msk [vmem:[#allocation2 + $0x10] sm:$0xf] %vm671_vm8, %v632_v57 }
 0x120   : > { %v650_v58 = vpop.permute.xlu1 %649 }
 0x121   : > { %685 = vst.msk [vmem:[#allocation2 + $0x34] sm:$0xf] %vm671_vm8, %v650_v58 }
 0x122   : > { %v648_v60 = vpop.permute.xlu0 %647 }
 0x123   : > { %684 = vst.msk [vmem:[#allocation2 + $0x30] sm:$0xf] %vm671_vm8, %v648_v60 }
 0x124   : > { %v638_v63 = vpop.permute.xlu1 %637 }
 0x125   : > { %679 = vst.msk [vmem:[#allocation2 + $0x1c] sm:$0xf] %vm671_vm8, %v638_v63 }
 0x126   : > { %v636_v62 = vpop.permute.xlu0 %635 }
 0x127   : > { %678 = vst.msk [vmem:[#allocation2 + $0x18] sm:$0xf] %vm671_vm8, %v636_v62 }
 0x128   : > { %v654_v2 = vpop.permute.xlu1 %653 }
 0x129   : > { %687 = vst.msk [vmem:[#allocation2 + $0x3c] sm:$0xf] %vm671_vm8, %v654_v2 }
 0x12a   : > { %v652_v1 = vpop.permute.xlu0 %651 }
 0x12b   : > { %686 = vst.msk [vmem:[#allocation2 + $0x38] sm:$0xf] %vm671_vm8, %v652_v1 }
 0x12c   : > { %v735_v4 = vpop.permute.xlu1 %734 }
 0x12d   : > { %778 = vst.msk [vmem:[#allocation2 + $0x14] sm:$0xf] %vm772_vm10, %v735_v4 }
 0x12e   : > { %v733_v59 = vpop.permute.xlu0 %732 }
 0x12f   : > { %777 = vst.msk [vmem:[#allocation2 + $0x10] sm:$0xf] %vm772_vm10, %v733_v59 }
 0x130   : > { %v751_v61 = vpop.permute.xlu1 %750 }
 0x131   : > { %786 = vst.msk [vmem:[#allocation2 + $0x34] sm:$0xf] %vm772_vm10, %v751_v61 }
 0x132   : > { %v749_v5 = vpop.permute.xlu0 %748 }
 0x133   : > { %785 = vst.msk [vmem:[#allocation2 + $0x30] sm:$0xf] %vm772_vm10, %v749_v5 }
 0x134   : > { %v739_v6 = vpop.permute.xlu1 %738 }
 0x135   : > { %780 = vst.msk [vmem:[#allocation2 + $0x1c] sm:$0xf] %vm772_vm10, %v739_v6 }
 0x136   : > { %v737_v3 = vpop.permute.xlu0 %736 }
 0x137   : > { %779 = vst.msk [vmem:[#allocation2 + $0x18] sm:$0xf] %vm772_vm10, %v737_v3 }
 0x138   : > { %v755_v7 = vpop.permute.xlu1 %754 }
 0x139   : > { %788 = vst.msk [vmem:[#allocation2 + $0x3c] sm:$0xf] %vm772_vm10, %v755_v7 }
 0x13a   : > { %v753_v8 = vpop.permute.xlu0 %752 }
 0x13b   : > { %787 = vst.msk [vmem:[#allocation2 + $0x38] sm:$0xf] %vm772_vm10, %v753_v8 }
 0x13c   : > { %v1016_v9 = vpop.permute.xlu1 %1015 }
 0x13d   : > { %1059 = vst.msk [vmem:[#allocation2 + $0x14] sm:$0xf] %vm1053_vm11, %v1016_v9 }
 0x13e   : > { %v1014_v10 = vpop.permute.xlu0 %1013 }
 0x13f   : > { %1058 = vst.msk [vmem:[#allocation2 + $0x10] sm:$0xf] %vm1053_vm11, %v1014_v10 }
 0x140   : > { %v1032_v11 = vpop.permute.xlu1 %1031 }
 0x141   : > { %1067 = vst.msk [vmem:[#allocation2 + $0x34] sm:$0xf] %vm1053_vm11, %v1032_v11 }
 0x142   : > { %v1030_v12 = vpop.permute.xlu0 %1029 }
 0x143   : > { %1066 = vst.msk [vmem:[#allocation2 + $0x30] sm:$0xf] %vm1053_vm11, %v1030_v12 }
 0x144   : > { %v1020_v14 = vpop.permute.xlu1 %1019 }
 0x145   : > { %1061 = vst.msk [vmem:[#allocation2 + $0x1c] sm:$0xf] %vm1053_vm11, %v1020_v14 }
 0x146   : > { %v1018_v15 = vpop.permute.xlu0 %1017 }
 0x147   : > { %1060 = vst.msk [vmem:[#allocation2 + $0x18] sm:$0xf] %vm1053_vm11, %v1018_v15 }
 0x148   : > { %v1036_v16 = vpop.permute.xlu1 %1035 }
 0x149   : > { %1069 = vst.msk [vmem:[#allocation2 + $0x3c] sm:$0xf] %vm1053_vm11, %v1036_v16 }
 0x14a   : > { %v1034_v18 = vpop.permute.xlu0 %1033 }
 0x14b   : > { %1068 = vst.msk [vmem:[#allocation2 + $0x38] sm:$0xf] %vm1053_vm11, %v1034_v18 }
 0x14c   : > { %v1185_v13 = vpop.permute.xlu1 %1184 }
 0x14d   : > { %1228 = vst.msk [vmem:[#allocation2 + $0x14] sm:$0xf] %vm1222_vm12, %v1185_v13 }
 0x14e   : > { %v1183_v19 = vpop.permute.xlu0 %1182 }
 0x14f   : > { %1227 = vst.msk [vmem:[#allocation2 + $0x10] sm:$0xf] %vm1222_vm12, %v1183_v19 }
 0x150   : > { %v1201_v17 = vpop.permute.xlu1 %1200 }
 0x151   : > { %1236 = vst.msk [vmem:[#allocation2 + $0x34] sm:$0xf] %vm1222_vm12, %v1201_v17 }
 0x152   : > { %v1199_v20 = vpop.permute.xlu0 %1198 }
 0x153   : > { %1235 = vst.msk [vmem:[#allocation2 + $0x30] sm:$0xf] %vm1222_vm12, %v1199_v20 }
 0x154   : > { %v1189_v21 = vpop.permute.xlu1 %1188 }
 0x155   : > { %1230 = vst.msk [vmem:[#allocation2 + $0x1c] sm:$0xf] %vm1222_vm12, %v1189_v21 }
 0x156   : > { %v1187_v22 = vpop.permute.xlu0 %1186 }
 0x157   : > { %1229 = vst.msk [vmem:[#allocation2 + $0x18] sm:$0xf] %vm1222_vm12, %v1187_v22 }
 0x158   : > { %v1205_v24 = vpop.permute.xlu1 %1204 }
 0x159   : > { %1238 = vst.msk [vmem:[#allocation2 + $0x3c] sm:$0xf] %vm1222_vm12, %v1205_v24 }
 0x15a   : > { %v1203_v32 = vpop.permute.xlu0 %1202 }
 0x15b   : > { %1237 = vst.msk [vmem:[#allocation2 + $0x38] sm:$0xf] %vm1222_vm12, %v1203_v32 }
 0x15c   : > { %v1286_v25 = vpop.permute.xlu1 %1285 }
 0x15d   : > { %1329 = vst.msk [vmem:[#allocation2 + $0x14] sm:$0xf] %vm1323_vm13, %v1286_v25 }
 0x15e   : > { %v1284_v26 = vpop.permute.xlu0 %1283 }
 0x15f   : > { %1328 = vst.msk [vmem:[#allocation2 + $0x10] sm:$0xf] %vm1323_vm13, %v1284_v26 }
 0x160   : > { %v1302_v27 = vpop.permute.xlu1 %1301 }
 0x161   : > { %1337 = vst.msk [vmem:[#allocation2 + $0x34] sm:$0xf] %vm1323_vm13, %v1302_v27 }
 0x162   : > { %v1300_v28 = vpop.permute.xlu0 %1299 }
 0x163   : > { %1336 = vst.msk [vmem:[#allocation2 + $0x30] sm:$0xf] %vm1323_vm13, %v1300_v28 }
 0x164   : > { %v1290_v29 = vpop.permute.xlu1 %1289 }
 0x165   : > { %1331 = vst.msk [vmem:[#allocation2 + $0x1c] sm:$0xf] %vm1323_vm13, %v1290_v29 }
 0x166   : > { %v1288_v30 = vpop.permute.xlu0 %1287 }
 0x167   : > { %1330 = vst.msk [vmem:[#allocation2 + $0x18] sm:$0xf] %vm1323_vm13, %v1288_v30 }
 0x168   : > { %v1306_v33 = vpop.permute.xlu1 %1305 }
 0x169   : > { %1339 = vst.msk [vmem:[#allocation2 + $0x3c] sm:$0xf] %vm1323_vm13, %v1306_v33 }
 0x16a   : > { %v1304_v23 = vpop.permute.xlu0 %1303 }
 0x16b   : > { %1338 = vst.msk [vmem:[#allocation2 + $0x38] sm:$0xf] %vm1323_vm13, %v1304_v23 }
 0x16c   : > { %v1567_v34 = vpop.permute.xlu1 %1566 }
 0x16d   : > { %1610 = vst.msk [vmem:[#allocation2 + $0x14] sm:$0xf] %vm1604_vm14, %v1567_v34 }
 0x16e   : > { %v1565_v31 = vpop.permute.xlu0 %1564 }
 0x16f   : > { %1609 = vst.msk [vmem:[#allocation2 + $0x10] sm:$0xf] %vm1604_vm14, %v1565_v31 }
 0x170   : > { %v1583_v35 = vpop.permute.xlu1 %1582 }
 0x171   : > { %1618 = vst.msk [vmem:[#allocation2 + $0x34] sm:$0xf] %vm1604_vm14, %v1583_v35 }
 0x172   : > { %v1581_v36 = vpop.permute.xlu0 %1580 }
 0x173   : > { %1617 = vst.msk [vmem:[#allocation2 + $0x30] sm:$0xf] %vm1604_vm14, %v1581_v36 }
 0x174   : > { %v1571_v37 = vpop.permute.xlu1 %1570 }
 0x175   : > { %1612 = vst.msk [vmem:[#allocation2 + $0x1c] sm:$0xf] %vm1604_vm14, %v1571_v37 }
 0x176   : > { %v1569_v38 = vpop.permute.xlu0 %1568 }
 0x177   : > { %1611 = vst.msk [vmem:[#allocation2 + $0x18] sm:$0xf] %vm1604_vm14, %v1569_v38 }
 0x178   : > { %v1587_v39 = vpop.permute.xlu1 %1586 }
 0x179   : > { %1620 = vst.msk [vmem:[#allocation2 + $0x3c] sm:$0xf] %vm1604_vm14, %v1587_v39 }
 0x17a   : > { %v1585_v41 = vpop.permute.xlu0 %1584 }
 0x17b   : > { %1619 = vst.msk [vmem:[#allocation2 + $0x38] sm:$0xf] %vm1604_vm14, %v1585_v41 }
 0x17c   : > { %v1736_v42 = vpop.permute.xlu1 %1735 }
 0x17d   : > { %1779 = vst.msk [vmem:[#allocation2 + $0x14] sm:$0xf] %vm1773_vm15, %v1736_v42 }
 0x17e   : > { %v1734_v43 = vpop.permute.xlu0 %1733 }
 0x17f   : > { %1778 = vst.msk [vmem:[#allocation2 + $0x10] sm:$0xf] %vm1773_vm15, %v1734_v43 }
 0x180   : > { %v1752_v44 = vpop.permute.xlu1 %1751 }
 0x181   : > { %1787 = vst.msk [vmem:[#allocation2 + $0x34] sm:$0xf] %vm1773_vm15, %v1752_v44 }
 0x182   : > { %v1750_v47 = vpop.permute.xlu0 %1749 }
 0x183   : > { %1786 = vst.msk [vmem:[#allocation2 + $0x30] sm:$0xf] %vm1773_vm15, %v1750_v47 }
 0x184   : > { %v1740_v40 = vpop.permute.xlu1 %1739 }
 0x185   : > { %1781 = vst.msk [vmem:[#allocation2 + $0x1c] sm:$0xf] %vm1773_vm15, %v1740_v40 }
 0x186   : > { %v1738_v48 = vpop.permute.xlu0 %1737  ;;  %v2397_v46 = vld [vmem:[#allocation2 + $0x10] sm:$0xff]  }
 0x187   : > { %1780 = vst.msk [vmem:[#allocation2 + $0x18] sm:$0xf] %vm1773_vm15, %v1738_v48  ;;  %2321 = vmatprep.mubr.msk.bf16.mxu0 %vm1873_vm0, %v2397_v46 }
 0x188   : > { %v1756_v49 = vpop.permute.xlu1 %1755 }
 0x189   : > { %1789 = vst.msk [vmem:[#allocation2 + $0x3c] sm:$0xf] %vm1773_vm15, %v1756_v49 }
 0x18a   : > { %v1754_v50 = vpop.permute.xlu0 %1753  ;;  %v2398_v51 = vld [vmem:[#allocation2 + $0x30] sm:$0xff]  }
 0x18b   : > { %1788 = vst.msk [vmem:[#allocation2 + $0x38] sm:$0xf] %vm1773_vm15, %v1754_v50  ;;  %2329 = vmatprep.mubr.msk.bf16.mxu1 %vm1873_vm0, %v2398_v51 }
 0x18e   : > { %v2399_v52 = vld [vmem:[#allocation2 + $0x18] sm:$0xff]  }
 0x18f   : > { %2322 = vmatmul.mubr.msk.bf16.gmra.mxu0 %vm1873_vm0, %v2399_v52 }
 0x192   : > { %v2400_v45 = vld [vmem:[#allocation2 + $0x38] sm:$0xff]  }
 0x193   : > { %2330 = vmatmul.mubr.msk.bf16.gmra.mxu1 %vm1873_vm0, %v2400_v45 }
 0x1d7   : > { %v2319_v54 = vpop.f32.mrf.mxu0 }
 0x1d8   : > { %v1945_v55 = vadd.f32 %v2319_v54, %v2277_v53 }
 0x1d9   : > { %v1936_v56 = vpop.f32.mrf.mxu0 }
 0x1da   : > { %2001 = vst [vmem:[%s3293_s27 + $0x10] sm:$0xff] %v1945_v55  ;;  %v1937_v0 = vadd.f32 %v2277_v53, %v1936_v56 }
 0x1db   : > { %v2320_v57 = vpop.f32.mrf.mxu0  ;;  %v2327_v58 = vpop.f32.mrf.mxu1 }
 0x1dc   : > { %1999 = vst [vmem:[%s3293_s27] sm:$0xff] %v1937_v0  ;;  %v1948_v60 = vadd.f32 %v2320_v57, %v2277_v53  ;;  %v1977_v63 = vadd.f32 %v2327_v58, %v2277_v53 }
 0x1dd   : > { %v1939_v62 = vpop.f32.mrf.mxu0  ;;  %v1968_v2 = vpop.f32.mrf.mxu1 }
 0x1de   : > { %2002 = vst [vmem:[%s3293_s27 + $0x18] sm:$0xff] %v1948_v60  ;;  %2009 = vst [vmem:[%s3293_s27 + $0x50] sm:$0xff] %v1977_v63  ;;  %v1940_v1 = vadd.f32 %v2277_v53, %v1939_v62  ;;  %v1969_v4 = vadd.f32 %v2277_v53, %v1968_v2 }
 0x1df   : > { %v2328_v59 = vpop.f32.mrf.mxu1 }
 0x1e0   : > { %2000 = vst [vmem:[%s3293_s27 + $0x8] sm:$0xff] %v1940_v1  ;;  %2007 = vst [vmem:[%s3293_s27 + $0x40] sm:$0xff] %v1969_v4  ;;  %v1980_v61 = vadd.f32 %v2328_v59, %v2277_v53 }
 0x1e1   : > { %v1971_v5 = vpop.f32.mrf.mxu1 }
 0x1e2   : > { %2010 = vst [vmem:[%s3293_s27 + $0x58] sm:$0xff] %v1980_v61  ;;  %v1972_v6 = vadd.f32 %v2277_v53, %v1971_v5 }
 0x1e4   : > { %2008 = vst [vmem:[%s3293_s27 + $0x48] sm:$0xff] %v1972_v6 }
 0x24f   : > { %v2323_v3 = vpop.f32.mrf.mxu0 }
 0x250   : > { %v1961_v7 = vadd.f32 %v2323_v3, %v2277_v53 }
 0x251   : > { %v1952_v8 = vpop.f32.mrf.mxu0 }
 0x252   : > { %2005 = vst [vmem:[%s3293_s27 + $0x30] sm:$0xff] %v1961_v7  ;;  %v1953_v9 = vadd.f32 %v2277_v53, %v1952_v8 }
 0x253   : > { %v2324_v10 = vpop.f32.mrf.mxu0  ;;  %v2331_v11 = vpop.f32.mrf.mxu1 }
 0x254   : > { %2003 = vst [vmem:[%s3293_s27 + $0x20] sm:$0xff] %v1953_v9  ;;  %v1964_v12 = vadd.f32 %v2324_v10, %v2277_v53  ;;  %v1993_v14 = vadd.f32 %v2331_v11, %v2277_v53 }
 0x255   : > { %v1955_v15 = vpop.f32.mrf.mxu0  ;;  %v1984_v16 = vpop.f32.mrf.mxu1 }
 0x256   : > { %2006 = vst [vmem:[%s3293_s27 + $0x38] sm:$0xff] %v1964_v12  ;;  %2013 = vst [vmem:[%s3293_s27 + $0x70] sm:$0xff] %v1993_v14  ;;  %v1956_v18 = vadd.f32 %v2277_v53, %v1955_v15  ;;  %v1985_v13 = vadd.f32 %v2277_v53, %v1984_v16 }
 0x257   : > { %v2332_v19 = vpop.f32.mrf.mxu1 }
 0x258   : > { %2004 = vst [vmem:[%s3293_s27 + $0x28] sm:$0xff] %v1956_v18  ;;  %2011 = vst [vmem:[%s3293_s27 + $0x60] sm:$0xff] %v1985_v13  ;;  %v1996_v17 = vadd.f32 %v2332_v19, %v2277_v53 }
 0x259   : > { %v1987_v20 = vpop.f32.mrf.mxu1 }
 0x25a   : > { %2014 = vst [vmem:[%s3293_s27 + $0x78] sm:$0xff] %v1996_v17  ;;  %v1988_v21 = vadd.f32 %v2277_v53, %v1987_v20 }
 0x25c   : > { %2012 = vst [vmem:[%s3293_s27 + $0x68] sm:$0xff] %v1988_v21 }
 0x25d PF: > { %s13_s16 = sadd.s32 1, %s2439_s16   ;;  %s3334_s12 = smov %s2431_s14 }
 0x25e   : > { %p10_p7 = scmp.ge.s32.totalorder %s13_s16, 6   ;;  %s3335_s13 = smov %s2435_s15 }
 0x25f   : > { %s3336_s14 = smov %s3339_s17  ;;  %s3337_s15 = smov %s3343_s18 }
 0x260   :  { %12 = sbr.rel (!%p10_p7) target bundleno = 3 (0x3), region = 65 }

</bundles_post_ra>
